<compile_context>
chip_gen: v7x
topology: tpu7x:2x2x1
jax: 0.10.0
libtpu: 0.0.40
codegen_flags: <defaults>
</compile_context>

<pallas_src>
import jax
import jax.numpy as jnp
from jax import lax
from jax.experimental import pallas as pl
from jax.experimental.pallas import tpu as pltpu

H = 16
W = 16
C_IN = 2
C_MID = 16
C_OUT = 4
K = 3

HP = H + 2                      # 18 zero-padded rows
WP = W + 2                      # 18 zero-padded cols
LANE_IN = WP * C_IN             # 36   input lane  = (wp, ci)
LANE_1 = W * C_MID              # 256  conv1 lane  = (w,  co)
LANE_1P = (W // 2) * C_MID      # 128  pooled lane = (w', co)
LANE_2 = (W // 2) * C_OUT       # 32   conv2 lane  = (w', co)
K1 = K * LANE_IN                # 108  conv1 GEMM contraction (kh, wp, ci)
K2 = K * LANE_1P                # 384  conv2 GEMM contraction (kh, w', ci)
OUT_FLAT = (H // 4) * (W // 4) * C_OUT   # 64


def _round_up(x, m):
    return (x + m - 1) // m * m


def autoencoder_kernel(x_ref, t1_ref, b1_ref, t2_ref, b2_ref, o_ref):
    nt = x_ref.shape[1]                   # images in this block (multiple of 8)
    h2, h4 = H // 2, H // 4
    w2, w4 = W // 2, W // 4

    x = x_ref[...]                                                   # (18, nt, 36)

    # ---- conv1 as ONE Toeplitz GEMM + bias + relu --------------------------
    # LHS rows = (h, n); LHS lanes = (kh, wp, ci); RHS cols = (w, co).
    lhs1 = jnp.concatenate([x[kh:kh + H] for kh in range(K)], axis=-1)   # (16, nt, 108)
    y1 = jnp.dot(lhs1.reshape(H * nt, K1), t1_ref[...],
                 preferred_element_type=jnp.float32)                 # (16*nt, 256)
    y1 = jnp.maximum(y1 + b1_ref[...], 0.0)
    y1 = y1.reshape(H, nt, LANE_1)                                   # (16, nt, 256)

    # ---- maxpool 2x2 (rows: leading-axis max; cols: 16-lane group max) -----
    t = y1.reshape(h2, 2, nt, LANE_1)
    ph = jnp.maximum(t[:, 0], t[:, 1])                               # (8, nt, 256)
    p1 = jnp.concatenate(
        [jnp.maximum(ph[..., (2 * k) * C_MID:(2 * k + 1) * C_MID],
                     ph[..., (2 * k + 1) * C_MID:(2 * k + 2) * C_MID])
         for k in range(w2)], axis=-1)                               # (8, nt, 128)

    # ---- conv2: row zero-pad in registers + ONE Toeplitz GEMM --------------
    zr = jnp.zeros((1, nt, LANE_1P), jnp.float32)
    p1p = jnp.concatenate([zr, p1, zr], axis=0)                      # (10, nt, 128)
    # 128-lane aligned concat of the 3 row-shifted views -> pure vreg copies.
    lhs2 = jnp.concatenate([p1p[kh:kh + h2] for kh in range(K)], axis=-1)  # (8, nt, 384)
    y2 = jnp.dot(lhs2.reshape(h2 * nt, K2), t2_ref[...],
                 preferred_element_type=jnp.float32)                 # (8*nt, 32)
    y2 = jnp.maximum(y2 + b2_ref[...], 0.0)
    y2 = y2.reshape(h2, nt, LANE_2)                                  # (8, nt, 32)

    # ---- maxpool 2x2 again --------------------------------------------------
    t = y2.reshape(h4, 2, nt, LANE_2)
    ph2 = jnp.maximum(t[:, 0], t[:, 1])                              # (4, nt, 32)
    p2 = jnp.concatenate(
        [jnp.maximum(ph2[..., (2 * k) * C_OUT:(2 * k + 1) * C_OUT],
                     ph2[..., (2 * k + 1) * C_OUT:(2 * k + 2) * C_OUT])
         for k in range(w4)], axis=-1)                               # (4, nt, 16)

    # ---- lane-dense output block: flat lane index = h*16 + w*4 + c ---------
    o_ref[...] = jnp.concatenate([p2[i] for i in range(h4)], axis=-1)    # (nt, 64)


def _toeplitz_conv1(w1):
    # T1[kh*36 + wp*2 + ci, w*16 + co] = w1[co, ci, kh, wp - w] if 0<=wp-w<3 else 0
    w1t = jnp.transpose(w1.astype(jnp.float32), (2, 3, 1, 0))        # (kh, kw, ci, co)
    d = jnp.arange(WP)[:, None] - jnp.arange(W)[None, :]             # (18, 16)
    valid = (d >= 0) & (d < K)
    g = w1t[:, jnp.clip(d, 0, K - 1), :, :]                          # (3, 18, 16, 2, 16)
    g = g * valid[None, :, :, None, None]
    g = jnp.transpose(g, (0, 1, 3, 2, 4))                            # (kh, wp, ci, w, co)
    return g.reshape(K1, LANE_1)                                     # (108, 256)


def _toeplitz_conv2(w2):
    # T2[kh*128 + wi*16 + ci, wo*4 + co] = w2[co, ci, kh, wi - wo + 1] if valid else 0
    w2t = jnp.transpose(w2.astype(jnp.float32), (2, 3, 1, 0))        # (kh, kw, ci, co)
    w2n = W // 2
    d = jnp.arange(w2n)[:, None] - jnp.arange(w2n)[None, :] + 1      # (8, 8)
    valid = (d >= 0) & (d < K)
    g = w2t[:, jnp.clip(d, 0, K - 1), :, :]                          # (3, 8, 8, 16, 4)
    g = g * valid[None, :, :, None, None]
    g = jnp.transpose(g, (0, 1, 3, 2, 4))                            # (kh, wi, ci, wo, co)
    return g.reshape(K2, LANE_2)                                     # (384, 32)


def autoencoder_forward(x_nchw, w1, b1, w2, b2, n_tile=64):
    n, cin, h, w = x_nchw.shape
    assert (cin, h, w) == (C_IN, H, W)

    nt = _round_up(min(n_tile, _round_up(n, 8)), 8)   # images per grid step
    n_pad = _round_up(n, nt)

    # --- layout glue (plain JAX, tiny: just transpose + pad of the raw input)
    xt = jnp.transpose(x_nchw.astype(jnp.float32), (2, 0, 3, 1))     # (h, n, w, ci)
    xt = jnp.pad(xt, ((1, 1), (0, n_pad - n), (1, 1), (0, 0)))       # (18, Np, 18, 2)
    xk = xt.reshape(HP, n_pad, LANE_IN)                              # (18, Np, 36)

    t1 = _toeplitz_conv1(w1)                                         # (108, 256)
    t2 = _toeplitz_conv2(w2)                                         # (384, 32)
    b1t = jnp.tile(b1.astype(jnp.float32), W)[None, :]               # (1, 256)
    b2t = jnp.tile(b2.astype(jnp.float32), W // 2)[None, :]          # (1, 32)

    out_flat = pl.pallas_call(
        autoencoder_kernel,
        out_shape=jax.ShapeDtypeStruct((n_pad, OUT_FLAT), jnp.float32),
        grid_spec=pltpu.PrefetchScalarGridSpec(
            num_scalar_prefetch=0,
            grid=(n_pad // nt,),
            in_specs=[
                pl.BlockSpec((HP, nt, LANE_IN), lambda b: (0, b, 0)),
                pl.BlockSpec((K1, LANE_1), lambda b: (0, 0)),
                pl.BlockSpec((1, LANE_1), lambda b: (0, 0)),
                pl.BlockSpec((K2, LANE_2), lambda b: (0, 0)),
                pl.BlockSpec((1, LANE_2), lambda b: (0, 0)),
            ],
            out_specs=pl.BlockSpec((nt, OUT_FLAT), lambda b: (b, 0)),
        ),
        compiler_params=pltpu.CompilerParams(
            dimension_semantics=("parallel",),
            vmem_limit_bytes=32 * 1024 * 1024),
    )(xk, t1, b1t, t2, b2t)

    out = out_flat[:n].reshape(n, H // 4, W // 4, C_OUT)     # (n, h, w, c)
    return jnp.transpose(out, (0, 3, 1, 2))                  # NCHW


def _reference_forward(x, w1, b1, w2, b2):
    # Pure-JAX reference (XLA convs) for a correctness sanity check.
    dn = ('NCHW', 'OIHW', 'NCHW')
    y = lax.conv_general_dilated(x, w1, (1, 1), [(1, 1), (1, 1)],
                                 dimension_numbers=dn)
    y = jax.nn.relu(y + b1[None, :, None, None])
    y = lax.reduce_window(y, -jnp.inf, lax.max, (1, 1, 2, 2), (1, 1, 2, 2),
                          'VALID')
    y = lax.conv_general_dilated(y, w2, (1, 1), [(1, 1), (1, 1)],
                                 dimension_numbers=dn)
    y = jax.nn.relu(y + b2[None, :, None, None])
    y = lax.reduce_window(y, -jnp.inf, lax.max, (1, 1, 2, 2), (1, 1, 2, 2),
                          'VALID')
    return y


if __name__ == "__main__":
    key = jax.random.PRNGKey(0)
    k1, k2, k3, k4, k5 = jax.random.split(key, 5)
    # Deterministic synthetic parameters (shapes from Autoencoder.__init__).
    x = jax.random.normal(k1, (2, C_IN, H, W), jnp.float32)
    w1 = jax.random.normal(k2, (C_MID, C_IN, 3, 3), jnp.float32) * 0.1
    b1 = jax.random.normal(k3, (C_MID,), jnp.float32) * 0.1
    w2 = jax.random.normal(k4, (C_OUT, C_MID, 3, 3), jnp.float32) * 0.1
    b2 = jax.random.normal(k5, (C_OUT,), jnp.float32) * 0.1

    out = autoencoder_forward(x, w1, b1, w2, b2)
    out = jax.block_until_ready(out)

    ref = _reference_forward(x, w1, b1, w2, b2)
    assert out.shape == (2, C_OUT, H // 4, W // 4), out.shape
    assert jnp.allclose(out, ref, atol=1e-4, rtol=1e-4), \
        float(jnp.max(jnp.abs(out - ref)))
    print("KERNEL_OK")
</pallas_src>

<mosaic_0001>
module attributes {stable_mosaic.version = 11 : i64} {
  func.func @autoencoder_kernel(%arg0: i32, %arg1: memref<18x8x36xf32, #tpu.memory_space<vmem>>, %arg2: memref<108x256xf32, #tpu.memory_space<vmem>>, %arg3: memref<1x256xf32, #tpu.memory_space<vmem>>, %arg4: memref<384x32xf32, #tpu.memory_space<vmem>>, %arg5: memref<1x32xf32, #tpu.memory_space<vmem>>, %arg6: memref<8x64xf32, #tpu.memory_space<vmem>>) attributes {dimension_semantics = [#tpu.dimension_semantics<parallel>], iteration_bounds = array<i64: 1>, scalar_prefetch = 0 : i64, scratch_operands = 0 : i64, tpu.core_type = #tpu.core_type<tc>, window_params = [{transform_indices = @transform_0, window_bounds = array<i64: 18, 8, 36>}, {pipeline_mode = #tpu.pipeline_mode<synchronous>, transform_indices = @transform_1, window_bounds = array<i64: 108, 256>}, {pipeline_mode = #tpu.pipeline_mode<synchronous>, transform_indices = @transform_2, window_bounds = array<i64: 1, 256>}, {pipeline_mode = #tpu.pipeline_mode<synchronous>, transform_indices = @transform_3, window_bounds = array<i64: 384, 32>}, {pipeline_mode = #tpu.pipeline_mode<synchronous>, transform_indices = @transform_4, window_bounds = array<i64: 1, 32>}, {transform_indices = @transform_5, window_bounds = array<i64: 8, 64>}]} {
    %c0 = arith.constant 0 : index
    %c0_0 = arith.constant 0 : index
    %c0_1 = arith.constant 0 : index
    %0 = vector.load %arg1[%c0, %c0_0, %c0_1] : memref<18x8x36xf32, #tpu.memory_space<vmem>>, vector<18x8x36xf32>
    %1 = vector.extract_strided_slice %0 {offsets = [0, 0, 0], sizes = [16, 8, 36], strides = [1, 1, 1]} : vector<18x8x36xf32> to vector<16x8x36xf32>
    %2 = vector.extract_strided_slice %0 {offsets = [1, 0, 0], sizes = [16, 8, 36], strides = [1, 1, 1]} : vector<18x8x36xf32> to vector<16x8x36xf32>
    %3 = vector.extract_strided_slice %0 {offsets = [2, 0, 0], sizes = [16, 8, 36], strides = [1, 1, 1]} : vector<18x8x36xf32> to vector<16x8x36xf32>
    %4 = tpu.concatenate %1, %2, %3 in 2 : vector<16x8x36xf32>, vector<16x8x36xf32>, vector<16x8x36xf32> -> vector<16x8x108xf32>
    %5 = vector.shape_cast %4 : vector<16x8x108xf32> to vector<128x108xf32>
    %c0_2 = arith.constant 0 : index
    %c0_3 = arith.constant 0 : index
    %6 = vector.load %arg2[%c0_2, %c0_3] : memref<108x256xf32, #tpu.memory_space<vmem>>, vector<108x256xf32>
    %cst = arith.constant dense<0.000000e+00> : vector<128x256xf32>
    %7 = tpu.matmul %5, %6, %cst {dimension_numbers = #tpu.dot_dimension_numbers<[1], [0], [0], [1], [0, 0, 1, 1], [], []>} : vector<128x108xf32>, vector<108x256xf32>, vector<128x256xf32> -> vector<128x256xf32>
    %c0_4 = arith.constant 0 : index
    %c0_5 = arith.constant 0 : index
    %8 = vector.load %arg3[%c0_4, %c0_5] : memref<1x256xf32, #tpu.memory_space<vmem>>, vector<1x256xf32>
    %9 = vector.broadcast %8 : vector<1x256xf32> to vector<128x256xf32>
    %10 = arith.addf %7, %9 : vector<128x256xf32>
    %cst_6 = arith.constant 0.000000e+00 : f32
    %11 = vector.broadcast %cst_6 : f32 to vector<128x256xf32>
    %12 = arith.maximumf %10, %11 : vector<128x256xf32>
    %13 = vector.shape_cast %12 : vector<128x256xf32> to vector<16x8x256xf32>
    %14 = vector.shape_cast %13 : vector<16x8x256xf32> to vector<8x2x8x256xf32>
    %15 = vector.extract_strided_slice %14 {offsets = [0, 0, 0, 0], sizes = [8, 1, 8, 256], strides = [1, 1, 1, 1]} : vector<8x2x8x256xf32> to vector<8x1x8x256xf32>
    %16 = vector.shape_cast %15 : vector<8x1x8x256xf32> to vector<8x8x256xf32>
    %17 = vector.extract_strided_slice %14 {offsets = [0, 1, 0, 0], sizes = [8, 1, 8, 256], strides = [1, 1, 1, 1]} : vector<8x2x8x256xf32> to vector<8x1x8x256xf32>
    %18 = vector.shape_cast %17 : vector<8x1x8x256xf32> to vector<8x8x256xf32>
    %19 = arith.maximumf %16, %18 : vector<8x8x256xf32>
    %20 = vector.extract_strided_slice %19 {offsets = [0, 0, 0], sizes = [8, 8, 16], strides = [1, 1, 1]} : vector<8x8x256xf32> to vector<8x8x16xf32>
    %21 = vector.extract_strided_slice %19 {offsets = [0, 0, 16], sizes = [8, 8, 16], strides = [1, 1, 1]} : vector<8x8x256xf32> to vector<8x8x16xf32>
    %22 = arith.maximumf %20, %21 : vector<8x8x16xf32>
    %23 = vector.extract_strided_slice %19 {offsets = [0, 0, 32], sizes = [8, 8, 16], strides = [1, 1, 1]} : vector<8x8x256xf32> to vector<8x8x16xf32>
    %24 = vector.extract_strided_slice %19 {offsets = [0, 0, 48], sizes = [8, 8, 16], strides = [1, 1, 1]} : vector<8x8x256xf32> to vector<8x8x16xf32>
    %25 = arith.maximumf %23, %24 : vector<8x8x16xf32>
    %26 = vector.extract_strided_slice %19 {offsets = [0, 0, 64], sizes = [8, 8, 16], strides = [1, 1, 1]} : vector<8x8x256xf32> to vector<8x8x16xf32>
    %27 = vector.extract_strided_slice %19 {offsets = [0, 0, 80], sizes = [8, 8, 16], strides = [1, 1, 1]} : vector<8x8x256xf32> to vector<8x8x16xf32>
    %28 = arith.maximumf %26, %27 : vector<8x8x16xf32>
    %29 = vector.extract_strided_slice %19 {offsets = [0, 0, 96], sizes = [8, 8, 16], strides = [1, 1, 1]} : vector<8x8x256xf32> to vector<8x8x16xf32>
    %30 = vector.extract_strided_slice %19 {offsets = [0, 0, 112], sizes = [8, 8, 16], strides = [1, 1, 1]} : vector<8x8x256xf32> to vector<8x8x16xf32>
    %31 = arith.maximumf %29, %30 : vector<8x8x16xf32>
    %32 = vector.extract_strided_slice %19 {offsets = [0, 0, 128], sizes = [8, 8, 16], strides = [1, 1, 1]} : vector<8x8x256xf32> to vector<8x8x16xf32>
    %33 = vector.extract_strided_slice %19 {offsets = [0, 0, 144], sizes = [8, 8, 16], strides = [1, 1, 1]} : vector<8x8x256xf32> to vector<8x8x16xf32>
    %34 = arith.maximumf %32, %33 : vector<8x8x16xf32>
    %35 = vector.extract_strided_slice %19 {offsets = [0, 0, 160], sizes = [8, 8, 16], strides = [1, 1, 1]} : vector<8x8x256xf32> to vector<8x8x16xf32>
    %36 = vector.extract_strided_slice %19 {offsets = [0, 0, 176], sizes = [8, 8, 16], strides = [1, 1, 1]} : vector<8x8x256xf32> to vector<8x8x16xf32>
    %37 = arith.maximumf %35, %36 : vector<8x8x16xf32>
    %38 = vector.extract_strided_slice %19 {offsets = [0, 0, 192], sizes = [8, 8, 16], strides = [1, 1, 1]} : vector<8x8x256xf32> to vector<8x8x16xf32>
    %39 = vector.extract_strided_slice %19 {offsets = [0, 0, 208], sizes = [8, 8, 16], strides = [1, 1, 1]} : vector<8x8x256xf32> to vector<8x8x16xf32>
    %40 = arith.maximumf %38, %39 : vector<8x8x16xf32>
    %41 = vector.extract_strided_slice %19 {offsets = [0, 0, 224], sizes = [8, 8, 16], strides = [1, 1, 1]} : vector<8x8x256xf32> to vector<8x8x16xf32>
    %42 = vector.extract_strided_slice %19 {offsets = [0, 0, 240], sizes = [8, 8, 16], strides = [1, 1, 1]} : vector<8x8x256xf32> to vector<8x8x16xf32>
    %43 = arith.maximumf %41, %42 : vector<8x8x16xf32>
    %44 = tpu.concatenate %22, %25, %28, %31, %34, %37, %40, %43 in 2 : vector<8x8x16xf32>, vector<8x8x16xf32>, vector<8x8x16xf32>, vector<8x8x16xf32>, vector<8x8x16xf32>, vector<8x8x16xf32>, vector<8x8x16xf32>, vector<8x8x16xf32> -> vector<8x8x128xf32>
    %cst_7 = arith.constant 0.000000e+00 : f32
    %45 = vector.broadcast %cst_7 : f32 to vector<1x8x128xf32>
    %46 = tpu.concatenate %45, %44, %45 in 0 : vector<1x8x128xf32>, vector<8x8x128xf32>, vector<1x8x128xf32> -> vector<10x8x128xf32>
    %47 = vector.extract_strided_slice %46 {offsets = [0, 0, 0], sizes = [8, 8, 128], strides = [1, 1, 1]} : vector<10x8x128xf32> to vector<8x8x128xf32>
    %48 = vector.extract_strided_slice %46 {offsets = [1, 0, 0], sizes = [8, 8, 128], strides = [1, 1, 1]} : vector<10x8x128xf32> to vector<8x8x128xf32>
    %49 = vector.extract_strided_slice %46 {offsets = [2, 0, 0], sizes = [8, 8, 128], strides = [1, 1, 1]} : vector<10x8x128xf32> to vector<8x8x128xf32>
    %50 = tpu.concatenate %47, %48, %49 in 2 : vector<8x8x128xf32>, vector<8x8x128xf32>, vector<8x8x128xf32> -> vector<8x8x384xf32>
    %51 = vector.shape_cast %50 : vector<8x8x384xf32> to vector<64x384xf32>
    %c0_8 = arith.constant 0 : index
    %c0_9 = arith.constant 0 : index
    %52 = vector.load %arg4[%c0_8, %c0_9] : memref<384x32xf32, #tpu.memory_space<vmem>>, vector<384x32xf32>
    %cst_10 = arith.constant dense<0.000000e+00> : vector<64x32xf32>
    %53 = tpu.matmul %51, %52, %cst_10 {dimension_numbers = #tpu.dot_dimension_numbers<[1], [0], [0], [1], [0, 0, 1, 1], [], []>} : vector<64x384xf32>, vector<384x32xf32>, vector<64x32xf32> -> vector<64x32xf32>
    %c0_11 = arith.constant 0 : index
    %c0_12 = arith.constant 0 : index
    %54 = vector.load %arg5[%c0_11, %c0_12] : memref<1x32xf32, #tpu.memory_space<vmem>>, vector<1x32xf32>
    %55 = vector.broadcast %54 : vector<1x32xf32> to vector<64x32xf32>
    %56 = arith.addf %53, %55 : vector<64x32xf32>
    %cst_13 = arith.constant 0.000000e+00 : f32
    %57 = vector.broadcast %cst_13 : f32 to vector<64x32xf32>
    %58 = arith.maximumf %56, %57 : vector<64x32xf32>
    %59 = vector.shape_cast %58 : vector<64x32xf32> to vector<8x8x32xf32>
    %60 = vector.shape_cast %59 : vector<8x8x32xf32> to vector<4x2x8x32xf32>
    %61 = vector.extract_strided_slice %60 {offsets = [0, 0, 0, 0], sizes = [4, 1, 8, 32], strides = [1, 1, 1, 1]} : vector<4x2x8x32xf32> to vector<4x1x8x32xf32>
    %62 = vector.shape_cast %61 : vector<4x1x8x32xf32> to vector<4x8x32xf32>
    %63 = vector.extract_strided_slice %60 {offsets = [0, 1, 0, 0], sizes = [4, 1, 8, 32], strides = [1, 1, 1, 1]} : vector<4x2x8x32xf32> to vector<4x1x8x32xf32>
    %64 = vector.shape_cast %63 : vector<4x1x8x32xf32> to vector<4x8x32xf32>
    %65 = arith.maximumf %62, %64 : vector<4x8x32xf32>
    %66 = vector.extract_strided_slice %65 {offsets = [0, 0, 0], sizes = [4, 8, 4], strides = [1, 1, 1]} : vector<4x8x32xf32> to vector<4x8x4xf32>
    %67 = vector.extract_strided_slice %65 {offsets = [0, 0, 4], sizes = [4, 8, 4], strides = [1, 1, 1]} : vector<4x8x32xf32> to vector<4x8x4xf32>
    %68 = arith.maximumf %66, %67 : vector<4x8x4xf32>
    %69 = vector.extract_strided_slice %65 {offsets = [0, 0, 8], sizes = [4, 8, 4], strides = [1, 1, 1]} : vector<4x8x32xf32> to vector<4x8x4xf32>
    %70 = vector.extract_strided_slice %65 {offsets = [0, 0, 12], sizes = [4, 8, 4], strides = [1, 1, 1]} : vector<4x8x32xf32> to vector<4x8x4xf32>
    %71 = arith.maximumf %69, %70 : vector<4x8x4xf32>
    %72 = vector.extract_strided_slice %65 {offsets = [0, 0, 16], sizes = [4, 8, 4], strides = [1, 1, 1]} : vector<4x8x32xf32> to vector<4x8x4xf32>
    %73 = vector.extract_strided_slice %65 {offsets = [0, 0, 20], sizes = [4, 8, 4], strides = [1, 1, 1]} : vector<4x8x32xf32> to vector<4x8x4xf32>
    %74 = arith.maximumf %72, %73 : vector<4x8x4xf32>
    %75 = vector.extract_strided_slice %65 {offsets = [0, 0, 24], sizes = [4, 8, 4], strides = [1, 1, 1]} : vector<4x8x32xf32> to vector<4x8x4xf32>
    %76 = vector.extract_strided_slice %65 {offsets = [0, 0, 28], sizes = [4, 8, 4], strides = [1, 1, 1]} : vector<4x8x32xf32> to vector<4x8x4xf32>
    %77 = arith.maximumf %75, %76 : vector<4x8x4xf32>
    %78 = tpu.concatenate %68, %71, %74, %77 in 2 : vector<4x8x4xf32>, vector<4x8x4xf32>, vector<4x8x4xf32>, vector<4x8x4xf32> -> vector<4x8x16xf32>
    %79 = vector.extract_strided_slice %78 {offsets = [0, 0, 0], sizes = [1, 8, 16], strides = [1, 1, 1]} : vector<4x8x16xf32> to vector<1x8x16xf32>
    %80 = vector.shape_cast %79 : vector<1x8x16xf32> to vector<8x16xf32>
    %81 = vector.extract_strided_slice %78 {offsets = [1, 0, 0], sizes = [1, 8, 16], strides = [1, 1, 1]} : vector<4x8x16xf32> to vector<1x8x16xf32>
    %82 = vector.shape_cast %81 : vector<1x8x16xf32> to vector<8x16xf32>
    %83 = vector.extract_strided_slice %78 {offsets = [2, 0, 0], sizes = [1, 8, 16], strides = [1, 1, 1]} : vector<4x8x16xf32> to vector<1x8x16xf32>
    %84 = vector.shape_cast %83 : vector<1x8x16xf32> to vector<8x16xf32>
    %85 = vector.extract_strided_slice %78 {offsets = [3, 0, 0], sizes = [1, 8, 16], strides = [1, 1, 1]} : vector<4x8x16xf32> to vector<1x8x16xf32>
    %86 = vector.shape_cast %85 : vector<1x8x16xf32> to vector<8x16xf32>
    %87 = tpu.concatenate %80, %82, %84, %86 in 1 : vector<8x16xf32>, vector<8x16xf32>, vector<8x16xf32>, vector<8x16xf32> -> vector<8x64xf32>
    %c0_14 = arith.constant 0 : index
    %c0_15 = arith.constant 0 : index
    %88 = vector.load %arg6[%c0_14, %c0_15] : memref<8x64xf32, #tpu.memory_space<vmem>>, vector<8x64xf32>
    tpu.vector_store %arg6[%c0_14, %c0_15], %87 {strides = array<i32>} : memref<8x64xf32, #tpu.memory_space<vmem>>, vector<8x64xf32>,
    return
  }
  func.func @transform_0(%arg0: i32) -> (i32, i32, i32) {
    %c0_i32 = arith.constant 0 : i32
    %c0_i32_0 = arith.constant 0 : i32
    %c0_i32_1 = arith.constant 0 : i32
    return %c0_i32, %arg0, %c0_i32_0 : i32, i32, i32
  }
  func.func @transform_1(%arg0: i32) -> (i32, i32) {
    %c0_i32 = arith.constant 0 : i32
    %c0_i32_0 = arith.constant 0 : i32
    %c0_i32_1 = arith.constant 0 : i32
    return %c0_i32, %c0_i32_0 : i32, i32
  }
  func.func @transform_2(%arg0: i32) -> (i32, i32) {
    %c0_i32 = arith.constant 0 : i32
    %c0_i32_0 = arith.constant 0 : i32
    %c0_i32_1 = arith.constant 0 : i32
    return %c0_i32, %c0_i32_0 : i32, i32
  }
  func.func @transform_3(%arg0: i32) -> (i32, i32) {
    %c0_i32 = arith.constant 0 : i32
    %c0_i32_0 = arith.constant 0 : i32
    %c0_i32_1 = arith.constant 0 : i32
    return %c0_i32, %c0_i32_0 : i32, i32
  }
  func.func @transform_4(%arg0: i32) -> (i32, i32) {
    %c0_i32 = arith.constant 0 : i32
    %c0_i32_0 = arith.constant 0 : i32
    %c0_i32_1 = arith.constant 0 : i32
    return %c0_i32, %c0_i32_0 : i32, i32
  }
  func.func @transform_5(%arg0: i32) -> (i32, i32) {
    %c0_i32 = arith.constant 0 : i32
    %c0_i32_0 = arith.constant 0 : i32
    return %arg0, %c0_i32 : i32, i32
  }
}

</mosaic_0001>

<bundles_post_ra>
// kernel: tpu_custom_call.1
= control target key start
LH: loop header
LB: loop body
LE: loop exit
PB: predicated region body
PF: predicated region fallthrough
CT: control target
= control target key end

     0   :  { %s1641_s22 = smov 36   ;;  %v1642_v3 = vmov 0.0   ;;  %s1643_s25 = smov 72   ;;  %s2431_s0 = inlined_call_operand.vmem [shape: f32[18,8,36], index: 0, kind: input, shape index: {}]   ;;  %s2432_s1 = inlined_call_operand.vmem [shape: f32[108,256], index: 1, kind: input, shape index: {}]   ;;  %s2433_s2 = inlined_call_operand.vmem [shape: f32[1,256], index: 2, kind: input, shape index: {}]   ;;  %s2434_s3 = inlined_call_operand.vmem [shape: f32[384,32], index: 3, kind: input, shape index: {}]   ;;  %s2435_s4 = inlined_call_operand.vmem [shape: f32[1,32], index: 4, kind: input, shape index: {}]   ;;  %s2436_s5 = inlined_call_operand.hbm [shape: f32[8,64], index: 5, kind: output, shape index: {}]  }
   0x1   :  { %v1689_v0 = vld [vmem:[%s2431_s0 + $0x8] sm:$0xff]  ;;  %v1694_v1 = vld [vmem:[%s2431_s0 + $0x10] sm:$0xff]  ;;  %v1703_v2 = vld [vmem:[%s2431_s0 + $0x18] sm:$0xff]  ;;  %346 = vmatprep.mubr.f32.mxu0 %v1642_v3 }
   0x2   :  { %55 = vrot.lane.b32.xlu0 %v1689_v0, %s1641_s22  ;;  %57 = vrot.lane.b32.xlu1 %v1694_v1, %s1641_s22  ;;  %v1713_v4 = vld [vmem:[%s2431_s0 + $0x20] sm:$0xff]  ;;  %v187_v5 = vld [vmem:[%s2432_s1 + $0x8] sm:$0xff] }
   0x3   :  { %v189_v6 = vld [vmem:[%s2432_s1 + $0x18] sm:$0xff]  ;;  %v186_v8 = vld [vmem:[%s2432_s1] sm:$0xff]  ;;  %v188_v9 = vld [vmem:[%s2432_s1 + $0x10] sm:$0xff] }
   0x4   :  { %v1343_v7 = vpack.c.bf16 %v189_v6, %v187_v5  ;;  %v191_v10 = vld [vmem:[%s2432_s1 + $0x28] sm:$0xff]  ;;  %v1345_v11 = vpack.c.bf16 %v188_v9, %v186_v8  ;;  %v193_v12 = vld [vmem:[%s2432_s1 + $0x38] sm:$0xff]  ;;  %v190_v13 = vld [vmem:[%s2432_s1 + $0x20] sm:$0xff] }
   0x5   :  { %v192_v14 = vld [vmem:[%s2432_s1 + $0x30] sm:$0xff]  ;;  %v1347_v15 = vpack.c.bf16 %v193_v12, %v191_v10  ;;  %v195_v16 = vld [vmem:[%s2432_s1 + $0x48] sm:$0xff]  ;;  %v197_v17 = vld [vmem:[%s2432_s1 + $0x58] sm:$0xff] }
   0x6   :  { %104 = vrot.lane.b32.xlu0 %v1694_v1, %s1643_s25  ;;  %106 = vrot.lane.b32.xlu1 %v1703_v2, %s1643_s25  ;;  %v1752_v18 = vld [vmem:[%s2431_s0 + $0x28] sm:$0xff]  ;;  %v1349_v19 = vpack.c.bf16 %v192_v14, %v190_v13  ;;  %v1351_v20 = vpack.c.bf16 %v197_v17, %v195_v16  ;;  %v194_v21 = vld [vmem:[%s2432_s1 + $0x40] sm:$0xff] }
   0x7   :  { %1344 = vmatprep.subr.bf16.mxu0 %v1343_v7  ;;  %v196_v22 = vld [vmem:[%s2432_s1 + $0x50] sm:$0xff]  ;;  %v199_v23 = vld [vmem:[%s2432_s1 + $0x68] sm:$0xff]  ;;  %v201_v24 = vld [vmem:[%s2432_s1 + $0x78] sm:$0xff] }
   0x8   :  { %1346 = vmatpush1.bf16.msra.mxu0 %v1345_v11  ;;  %v1773_v25 = vld [vmem:[%s2431_s0 + $0x30] sm:$0xff]  ;;  %v1353_v26 = vpack.c.bf16 %v196_v22, %v194_v21  ;;  %v1355_v27 = vpack.c.bf16 %v201_v24, %v199_v23  ;;  %v198_v28 = vld [vmem:[%s2432_s1 + $0x60] sm:$0xff] }
   0x9   :  { %1348 = vmatprep.subr.bf16.mxu0 %v1347_v15  ;;  %v200_v29 = vld [vmem:[%s2432_s1 + $0x70] sm:$0xff] }
   0xa   :  { %59 = vrot.lane.b32.xlu0 %v1703_v2, %s1641_s22  ;;  %108 = vrot.lane.b32.xlu1 %v1713_v4, %s1643_s25 }
   0xc   :  { %1350 = vmatpush1.bf16.msra.mxu0 %v1349_v19 }
   0xd   :  { %1352 = vmatprep.subr.bf16.mxu0 %v1351_v20 }
   0xe   :  { %61 = vrot.lane.b32.xlu0 %v1713_v4, %s1641_s22  ;;  %110 = vrot.lane.b32.xlu1 %v1752_v18, %s1643_s25 }
   0xf   :  { %10 = vsyncpa [#allocation3], 0  ;;  %v203_v30 = vld [vmem:[%s2432_s1 + $0x88] sm:$0xff]  ;;  %v205_v31 = vld [vmem:[%s2432_s1 + $0x98] sm:$0xff]  ;;  %v1357_v33 = vpack.c.bf16 %v200_v29, %v198_v28  ;;  %vm275_vm0 = vcmask 1043456   ;;  %vm1644_vm1 = vmmov 1  }
  0x10   :  { %v1794_v32 = vld [vmem:[%s2431_s0 + $0x38] sm:$0xff]  ;;  %1354 = vmatpush1.bf16.msra.mxu0 %v1353_v26  ;;  %v1359_v34 = vpack.c.bf16 %v205_v31, %v203_v30  ;;  %v202_v35 = vld [vmem:[%s2432_s1 + $0x80] sm:$0xff]  ;;  %v204_v36 = vld [vmem:[%s2432_s1 + $0x90] sm:$0xff]  ;;  %vm152_vm3 = vcmask 293888   ;;  %vm169_vm4 = vcmask 588800   ;;  %vm226_vm5 = vcmask 883712  }
  0x11   :  { %1356 = vmatprep.subr.bf16.mxu0 %v1355_v27  ;;  %v207_v37 = vld [vmem:[%s2432_s1 + $0xa8] sm:$0xff]  ;;  %v209_v38 = vld [vmem:[%s2432_s1 + $0xb8] sm:$0xff]  ;;  %v1815_v39 = vld [vmem:[%s2431_s0 + $0x40] sm:$0xff]  ;;  %v1361_v40 = vpack.c.bf16 %v204_v36, %v202_v35  ;;  %s1646_s27 = smov 96   ;;  %s1647_s28 = smov 64   ;;  %vm755_vm6 = vcmask 130048  }
  0x12   :  { %63 = vrot.lane.b32.xlu0 %v1752_v18, %s1641_s22  ;;  %112 = vrot.lane.b32.xlu1 %v1773_v25, %s1643_s25  ;;  %v1363_v41 = vpack.c.bf16 %v209_v38, %v207_v37  ;;  %v206_v42 = vld [vmem:[%s2432_s1 + $0xa0] sm:$0xff]  ;;  %v208_v43 = vld [vmem:[%s2432_s1 + $0xb0] sm:$0xff]  ;;  %vm1368_vm2 = vmpackc.low %vm275_vm0, %vm1644_vm1  ;;  %s1648_s29 = smov 80   ;;  %s1649_s30 = smov 32   ;;  %vm764_vm7 = vcmask 261120   ;;  %vm773_vm8 = vcmask 392192  }
  0x13   :  { %v211_v44 = vld [vmem:[%s2432_s1 + $0xc8] sm:$0xff]  ;;  %v213_v45 = vld [vmem:[%s2432_s1 + $0xd8] sm:$0xf]  ;;  %v1365_v47 = vpack.c.bf16 %v208_v43, %v206_v42  ;;  %v210_v49 = vld [vmem:[%s2432_s1 + $0xc0] sm:$0xff]  ;;  %s1650_s6 = smov 48   ;;  %s1651_s7 = smov 16  }
  0x14   :  { %1358 = vmatpush1.bf16.msra.mxu0 %v1357_v33  ;;  %v1836_v46 = vld [vmem:[%s2431_s0 + $0x48] sm:$0xff]  ;;  %v1367_v48 = vpack.c.bf16 %v213_v45, %v211_v44  ;;  %v212_v50 = vld [vmem:[%s2432_s1 + $0xd0] sm:$0xf]  ;;  %v1860_v53 = vld [vmem:[%s2431_s0 + $0x58] sm:$0xff]  ;;  %vm782_vm9 = vcmask 523264   ;;  %vm791_vm10 = vcmask 654336  }
  0x15   :  { %1360 = vmatprep.subr.bf16.mxu0 %v1359_v34  ;;  %v1851_v51 = vld [vmem:[%s2431_s0 + $0x50] sm:$0xff]  ;;  %v1370_v52 = vpack.c.bf16 %v212_v50, %v210_v49  ;;  %v1869_v54 = vld [vmem:[%s2431_s0 + $0x60] sm:$0xff]  ;;  %v1878_v55 = vld [vmem:[%s2431_s0 + $0x68] sm:$0xff]  ;;  %vm800_vm11 = vcmask 785408   ;;  %vm809_vm12 = vcmask 916480   ;;  %s1653_s15 = smov 116  }
  0x16   :  { %65 = vrot.lane.b32.xlu0 %v1773_v25, %s1641_s22  ;;  %114 = vrot.lane.b32.xlu1 %v1794_v32, %s1643_s25  ;;  %v1887_v56 = vld [vmem:[%s2431_s0 + $0x70] sm:$0xff]  ;;  %v1896_v57 = vld [vmem:[%s2431_s0 + $0x78] sm:$0xff]  ;;  %s1654_s16 = smov 120   ;;  %vm1155_vm13 = vcmask 31744   ;;  %vm1160_vm14 = vcmask 64512   ;;  %vm1165_vm15 = vcmask 97280  }
  0x17   :  { %v37_v58 = vld [vmem:[%s2431_s0 + $0x80] sm:$0xff]  ;;  %v38_v59 = vld [vmem:[%s2431_s0 + $0x88] sm:$0xff] }
  0x18   :  { %1362 = vmatpush1.bf16.msra.mxu0 %v1361_v40  ;;  %v21_v62 = vld [vmem:[%s2431_s0] sm:$0xff] }
  0x19   :  { %1364 = vmatprep.subr.bf16.mxu0 %v1363_v41 }
  0x1a   :  { %67 = vrot.lane.b32.xlu0 %v1794_v32, %s1641_s22  ;;  %116 = vrot.lane.b32.xlu1 %v1815_v39, %s1643_s25 }
  0x1c   :  { %1366 = vmatpush1.bf16.msra.mxu0 %v1365_v47 }
  0x1d   :  { %1369 = vmatprep.subr.msk.bf16.mxu0 %vm1368_vm2, %v1367_v48 }
  0x1e   :  { %69 = vrot.lane.b32.xlu0 %v1815_v39, %s1641_s22  ;;  %118 = vrot.lane.b32.xlu1 %v1836_v46, %s1643_s25 }
  0x20   :  { %1372 = vmatpush1.bf16.msk.msra.mxu0 %vm1368_vm2, %v1370_v52 }
  0x22   :  { %71 = vrot.lane.b32.xlu0 %v1836_v46, %s1641_s22  ;;  %120 = vrot.lane.b32.xlu1 %v1851_v51, %s1643_s25 }
  0x26   :  { %73 = vrot.lane.b32.xlu0 %v1851_v51, %s1641_s22  ;;  %122 = vrot.lane.b32.xlu1 %v1860_v53, %s1643_s25 }
  0x2a   :  { %75 = vrot.lane.b32.xlu0 %v1860_v53, %s1641_s22  ;;  %124 = vrot.lane.b32.xlu1 %v1869_v54, %s1643_s25 }
  0x2e   :  { %77 = vrot.lane.b32.xlu0 %v1869_v54, %s1641_s22  ;;  %126 = vrot.lane.b32.xlu1 %v1878_v55, %s1643_s25 }
  0x32   :  { %79 = vrot.lane.b32.xlu0 %v1878_v55, %s1641_s22  ;;  %128 = vrot.lane.b32.xlu1 %v1887_v56, %s1643_s25 }
  0x36   :  { %81 = vrot.lane.b32.xlu0 %v1887_v56, %s1641_s22  ;;  %130 = vrot.lane.b32.xlu1 %v1896_v57, %s1643_s25 }
  0x3a   :  { %83 = vrot.lane.b32.xlu0 %v1896_v57, %s1641_s22  ;;  %132 = vrot.lane.b32.xlu1 %v37_v58, %s1643_s25 }
  0x3e   :  { %85 = vrot.lane.b32.xlu0 %v37_v58, %s1641_s22  ;;  %134 = vrot.lane.b32.xlu1 %v38_v59, %s1643_s25 }
  0x74   :  { %v56_v60 = vpop.permute.xlu0 %55  ;;  %v58_v61 = vpop.permute.xlu1 %57 }
  0x75   :  { %v153_v63 = vsel %vm152_vm3, %v21_v62, %v56_v60  ;;  %v154_v8 = vsel %vm152_vm3, %v1689_v0, %v58_v61 }
  0x78   :  { %v105_v5 = vpop.permute.xlu0 %104  ;;  %v107_v6 = vpop.permute.xlu1 %106 }
  0x79   :  { %v170_v7 = vsel %vm169_vm4, %v153_v63, %v105_v5  ;;  %v171_v11 = vsel %vm169_vm4, %v154_v8, %v107_v6 }
  0x7a   :  { %1202 = vmatmul.mubr.msk.f32.vlgmr.msra.gmra.mrb[0].mxu0 %vm226_vm5, %v170_v7  ;;  %v214_v7 = vld [vmem:[%s2433_s2] sm:$0x3]  ;;  %s1645_s2 = smov 112  }
  0x7b   :  { %352 = vmatprep.mubr.f32.mxu0 %v1642_v3 }
  0x7c   :  { %v60_v9 = vpop.permute.xlu0 %59  ;;  %v109_v10 = vpop.permute.xlu1 %108 }
  0x7d   :  { %v155_v12 = vsel %vm152_vm3, %v1694_v1, %v60_v9 }
  0x7e   :  { %1203 = vmatmul.mubr.msk.f32.gmra.mrb[2].mxu0 %vm226_vm5, %v171_v11  ;;  %v172_v13 = vsel %vm169_vm4, %v155_v12, %v109_v10 }
  0x7f   :  { %358 = vmatprep.mubr.f32.mxu0 %v1642_v3 }
  0x80   :  { %v62_v14 = vpop.permute.xlu0 %61  ;;  %v111_v15 = vpop.permute.xlu1 %110 }
  0x81   :  { %v156_v0 = vsel %vm152_vm3, %v1703_v2, %v62_v14 }
  0x82   :  { %1204 = vmatmul.mubr.msk.f32.gmra.mrb[4].mxu0 %vm226_vm5, %v172_v13  ;;  %v173_v16 = vsel %vm169_vm4, %v156_v0, %v111_v15 }
  0x83   :  { %364 = vmatprep.mubr.f32.mxu0 %v1642_v3 }
  0x84   :  { %v64_v17 = vpop.permute.xlu0 %63  ;;  %v113_v19 = vpop.permute.xlu1 %112 }
  0x85   :  { %v157_v1 = vsel %vm152_vm3, %v1713_v4, %v64_v17 }
  0x86   :  { %1205 = vmatmul.mubr.msk.f32.gmra.mrb[6].mxu0 %vm226_vm5, %v173_v16  ;;  %v174_v20 = vsel %vm169_vm4, %v157_v1, %v113_v19 }
  0x87   :  { %370 = vmatprep.mubr.f32.mxu0 %v1642_v3 }
  0x88   :  { %v66_v21 = vpop.permute.xlu0 %65  ;;  %v115_v22 = vpop.permute.xlu1 %114 }
  0x89   :  { %v158_v2 = vsel %vm152_vm3, %v1752_v18, %v66_v21 }
  0x8a   :  { %1206 = vmatmul.mubr.msk.f32.gmra.mrb[8].mxu0 %vm226_vm5, %v174_v20  ;;  %v175_v23 = vsel %vm169_vm4, %v158_v2, %v115_v22 }
  0x8b   :  { %376 = vmatprep.mubr.f32.mxu0 %v1642_v3 }
  0x8c   :  { %v68_v24 = vpop.permute.xlu0 %67  ;;  %v117_v26 = vpop.permute.xlu1 %116 }
  0x8d   :  { %v159_v4 = vsel %vm152_vm3, %v1773_v25, %v68_v24 }
  0x8e   :  { %1207 = vmatmul.mubr.msk.f32.gmra.mrb[10].mxu0 %vm226_vm5, %v175_v23  ;;  %v176_v27 = vsel %vm169_vm4, %v159_v4, %v117_v26 }
  0x8f   :  { %382 = vmatprep.mubr.f32.mxu0 %v1642_v3 }
  0x90   :  { %v70_v28 = vpop.permute.xlu0 %69  ;;  %v119_v29 = vpop.permute.xlu1 %118 }
  0x91   :  { %v160_v18 = vsel %vm152_vm3, %v1794_v32, %v70_v28 }
  0x92   :  { %1208 = vmatmul.mubr.msk.f32.gmra.mrb[12].mxu0 %vm226_vm5, %v176_v27  ;;  %v177_v30 = vsel %vm169_vm4, %v160_v18, %v119_v29 }
  0x93   :  { %388 = vmatprep.mubr.f32.mxu0 %v1642_v3 }
  0x94   :  { %v72_v31 = vpop.permute.xlu0 %71  ;;  %v121_v33 = vpop.permute.xlu1 %120 }
  0x95   :  { %v161_v25 = vsel %vm152_vm3, %v1815_v39, %v72_v31 }
  0x96   :  { %1209 = vmatmul.mubr.msk.f32.gmra.mrb[14].mxu0 %vm226_vm5, %v177_v30  ;;  %v178_v34 = vsel %vm169_vm4, %v161_v25, %v121_v33 }
  0x97   :  { %394 = vmatprep.mubr.f32.mxu0 %v1642_v3 }
  0x98   :  { %v74_v35 = vpop.permute.xlu0 %73  ;;  %v123_v36 = vpop.permute.xlu1 %122 }
  0x99   :  { %v162_v32 = vsel %vm152_vm3, %v1836_v46, %v74_v35 }
  0x9a   :  { %1210 = vmatmul.mubr.msk.f32.gmra.mrb[16].mxu0 %vm226_vm5, %v178_v34  ;;  %v179_v37 = vsel %vm169_vm4, %v162_v32, %v123_v36 }
  0x9b   :  { %400 = vmatprep.mubr.f32.mxu0 %v1642_v3 }
  0x9c   :  { %v76_v38 = vpop.permute.xlu0 %75  ;;  %v125_v40 = vpop.permute.xlu1 %124 }
  0x9d   :  { %v163_v39 = vsel %vm152_vm3, %v1851_v51, %v76_v38 }
  0x9e   :  { %1211 = vmatmul.mubr.msk.f32.gmra.mrb[18].mxu0 %vm226_vm5, %v179_v37  ;;  %v180_v41 = vsel %vm169_vm4, %v163_v39, %v125_v40 }
  0x9f   :  { %406 = vmatprep.mubr.f32.mxu0 %v1642_v3 }
  0xa0   :  { %v78_v42 = vpop.permute.xlu0 %77  ;;  %v127_v43 = vpop.permute.xlu1 %126 }
  0xa1   :  { %v164_v44 = vsel %vm152_vm3, %v1860_v53, %v78_v42 }
  0xa2   :  { %1212 = vmatmul.mubr.msk.f32.gmra.mrb[20].mxu0 %vm226_vm5, %v180_v41  ;;  %v181_v45 = vsel %vm169_vm4, %v164_v44, %v127_v43 }
  0xa3   :  { %412 = vmatprep.mubr.f32.mxu0 %v1642_v3 }
  0xa4   :  { %v80_v46 = vpop.permute.xlu0 %79  ;;  %v129_v47 = vpop.permute.xlu1 %128 }
  0xa5   :  { %v165_v48 = vsel %vm152_vm3, %v1869_v54, %v80_v46 }
  0xa6   :  { %1213 = vmatmul.mubr.msk.f32.gmra.mrb[22].mxu0 %vm226_vm5, %v181_v45  ;;  %v182_v49 = vsel %vm169_vm4, %v165_v48, %v129_v47 }
  0xa7   :  { %418 = vmatprep.mubr.f32.mxu0 %v1642_v3 }
  0xa8   :  { %v82_v50 = vpop.permute.xlu0 %81  ;;  %v131_v51 = vpop.permute.xlu1 %130 }
  0xa9   :  { %v166_v52 = vsel %vm152_vm3, %v1878_v55, %v82_v50 }
  0xaa   :  { %1214 = vmatmul.mubr.msk.f32.gmra.mrb[24].mxu0 %vm226_vm5, %v182_v49  ;;  %v183_v53 = vsel %vm169_vm4, %v166_v52, %v131_v51 }
  0xab   :  { %424 = vmatprep.mubr.f32.mxu0 %v1642_v3 }
  0xac   :  { %v84_v58 = vpop.permute.xlu0 %83  ;;  %v133_v59 = vpop.permute.xlu1 %132 }
  0xad   :  { %v167_v54 = vsel %vm152_vm3, %v1887_v56, %v84_v58  ;;  %v216_v56 = vlaneseq }
  0xae   :  { %1215 = vmatmul.mubr.msk.f32.gmra.mrb[26].mxu0 %vm226_vm5, %v183_v53  ;;  %v184_v60 = vsel %vm169_vm4, %v167_v54, %v133_v59 }
  0xaf   :  { %430 = vmatprep.mubr.f32.mxu0 %v1642_v3  ;;  %v217_v5 = vshrl.u32 %v216_v56, 7 }
  0xb0   :  { %v86_v61 = vpop.permute.xlu0 %85  ;;  %v135_v62 = vpop.permute.xlu1 %134 }
  0xb1   :  { %v168_v55 = vsel %vm152_vm3, %v1896_v57, %v86_v61  ;;  %v218_v6 = vsub.s32 0, %v217_v5  ;;  %v222_v8 = vsub.s32 1, %v217_v5 }
  0xb2   :  { %1216 = vmatmul.mubr.msk.f32.gmra.mrb[28].mxu0 %vm226_vm5, %v184_v60  ;;  %v185_v63 = vsel %vm169_vm4, %v168_v55, %v135_v62 }
  0xb3   :  { %436 = vmatprep.mubr.f32.mxu0 %v1642_v3  ;;  %v1997_v9 = vrot.slane %v214_v7, %v218_v6  ;;  %v1999_v57 = vrot.slane %v214_v7, %v222_v8 }
  0xb6   :  { %1217 = vmatmul.mubr.msk.f32.gmra.mrb[30].mxu0 %vm226_vm5, %v185_v63 }
 0x14d   :  { %v348_v10 = vpop.f32.mrb[0].mxu0 }
 0x14e   :  { %v350_v11 = vpop.f32.mrb[1].mxu0  ;;  %v349_v12 = vadd.f32 %v348_v10, %v1997_v9 }
 0x14f   :  { %v351_v13 = vadd.f32 %v350_v11, %v1999_v57 }
 0x150   :  { %v443_v17 = vmax.f32 %v349_v12, 0.0 }
 0x151   :  { %v354_v14 = vpop.f32.mrb[2].mxu0  ;;  %v444_v1 = vmax.f32 %v351_v13, 0.0 }
 0x152   :  { %v355_v15 = vadd.f32 %v354_v14, %v1997_v9  ;;  %v356_v0 = vpop.f32.mrb[3].mxu0 }
 0x153   :  { %v357_v16 = vadd.f32 %v356_v0, %v1999_v57 }
 0x154   :  { %v445_v19 = vmax.f32 %v355_v15, 0.0 }
 0x155   :  { %v446_v20 = vmax.f32 %v357_v16, 0.0  ;;  %v360_v21 = vpop.f32.mrb[4].mxu0 }
 0x156   :  { %v2005_v22 = vmax.f32 %v443_v17, %v445_v19  ;;  %v362_v2 = vpop.f32.mrb[5].mxu0  ;;  %v361_v24 = vadd.f32 %v360_v21, %v1997_v9 }
 0x157   :  { %v2007_v23 = vmax.f32 %v444_v1, %v446_v20  ;;  %v363_v26 = vadd.f32 %v362_v2, %v1999_v57 }
 0x158   :  { %v447_v30 = vmax.f32 %v361_v24, 0.0 }
 0x159   :  { %v366_v4 = vpop.f32.mrb[6].mxu0  ;;  %v1452_v27 = vpack.i.bf16 %v2007_v23, %v2005_v22  ;;  %v448_v33 = vmax.f32 %v363_v26, 0.0 }
 0x15a   :  { %v367_v28 = vadd.f32 %v366_v4, %v1997_v9  ;;  %v368_v29 = vpop.f32.mrb[7].mxu0 }
 0x15b   :  { %v369_v18 = vadd.f32 %v368_v29, %v1999_v57  ;;  %1453 = vrot.lane.b32.xlu0 %v1452_v27, %s1645_s2 }
 0x15c   :  { %v449_v31 = vmax.f32 %v367_v28, 0.0 }
 0x15d   :  { %v450_v25 = vmax.f32 %v369_v18, 0.0  ;;  %v372_v34 = vpop.f32.mrb[8].mxu0 }
 0x15e   :  { %v2016_v35 = vmax.f32 %v447_v30, %v449_v31  ;;  %v374_v36 = vpop.f32.mrb[9].mxu0  ;;  %v373_v37 = vadd.f32 %v372_v34, %v1997_v9 }
 0x15f   :  { %v2018_v32 = vmax.f32 %v448_v33, %v450_v25  ;;  %v375_v38 = vadd.f32 %v374_v36, %v1999_v57 }
 0x160   :  { %v451_v44 = vmax.f32 %v373_v37, 0.0 }
 0x161   :  { %v378_v40 = vpop.f32.mrb[10].mxu0  ;;  %v1457_v39 = vpack.i.bf16 %v2018_v32, %v2016_v35  ;;  %v452_v46 = vmax.f32 %v375_v38, 0.0 }
 0x162   :  { %v379_v41 = vadd.f32 %v378_v40, %v1997_v9  ;;  %v380_v42 = vpop.f32.mrb[11].mxu0 }
 0x163   :  { %v381_v43 = vadd.f32 %v380_v42, %v1999_v57  ;;  %1458 = vrot.lane.b32.xlu1 %v1457_v39, %s1645_s2 }
 0x164   :  { %v453_v45 = vmax.f32 %v379_v41, 0.0 }
 0x165   :  { %v454_v47 = vmax.f32 %v381_v43, 0.0  ;;  %v384_v48 = vpop.f32.mrb[12].mxu0 }
 0x166   :  { %v2027_v49 = vmax.f32 %v451_v44, %v453_v45  ;;  %v386_v50 = vpop.f32.mrb[13].mxu0  ;;  %v385_v52 = vadd.f32 %v384_v48, %v1997_v9 }
 0x167   :  { %v2029_v51 = vmax.f32 %v452_v46, %v454_v47  ;;  %v387_v53 = vadd.f32 %v386_v50, %v1999_v57 }
 0x168   :  { %v455_v62 = vmax.f32 %v385_v52, 0.0 }
 0x169   :  { %v390_v58 = vpop.f32.mrb[14].mxu0  ;;  %v1462_v59 = vpack.i.bf16 %v2029_v51, %v2027_v49  ;;  %v456_v63 = vmax.f32 %v387_v53, 0.0 }
 0x16a   :  { %v391_v54 = vadd.f32 %v390_v58, %v1997_v9  ;;  %v392_v60 = vpop.f32.mrb[15].mxu0 }
 0x16b   :  { %v393_v61 = vadd.f32 %v392_v60, %v1999_v57  ;;  %1463 = vrot.lane.b32.xlu0 %v1462_v59, %s1645_s2 }
 0x16c   :  { %v457_v55 = vmax.f32 %v391_v54, 0.0 }
 0x16d   :  { %v458_v56 = vmax.f32 %v393_v61, 0.0  ;;  %v396_v5 = vpop.f32.mrb[16].mxu0 }
 0x16e   :  { %v2038_v6 = vmax.f32 %v455_v62, %v457_v55  ;;  %v398_v7 = vpop.f32.mrb[17].mxu0  ;;  %v397_v10 = vadd.f32 %v396_v5, %v1997_v9 }
 0x16f   :  { %v2040_v8 = vmax.f32 %v456_v63, %v458_v56  ;;  %v399_v11 = vadd.f32 %v398_v7, %v1999_v57 }
 0x170   :  { %v459_v16 = vmax.f32 %v397_v10, 0.0 }
 0x171   :  { %v402_v12 = vpop.f32.mrb[18].mxu0  ;;  %v1467_v13 = vpack.i.bf16 %v2040_v8, %v2038_v6  ;;  %v460_v19 = vmax.f32 %v399_v11, 0.0 }
 0x172   :  { %v403_v14 = vadd.f32 %v402_v12, %v1997_v9  ;;  %v404_v15 = vpop.f32.mrb[19].mxu0 }
 0x173   :  { %v405_v0 = vadd.f32 %v404_v15, %v1999_v57  ;;  %1468 = vrot.lane.b32.xlu1 %v1467_v13, %s1645_s2 }
 0x174   :  { %v461_v17 = vmax.f32 %v403_v14, 0.0 }
 0x175   :  { %v462_v1 = vmax.f32 %v405_v0, 0.0  ;;  %v408_v20 = vpop.f32.mrb[20].mxu0  ;;  %v818_v0 = vld [vmem:[%s2434_s3] sm:$0xff] }
 0x176   :  { %v2049_v21 = vmax.f32 %v459_v16, %v461_v17  ;;  %v410_v2 = vpop.f32.mrb[21].mxu0  ;;  %v409_v26 = vadd.f32 %v408_v20, %v1997_v9  ;;  %v819_v17 = vld [vmem:[%s2434_s3 + $0x8] sm:$0xff] }
 0x177   :  { %v2051_v24 = vmax.f32 %v460_v19, %v462_v1  ;;  %v411_v4 = vadd.f32 %v410_v2, %v1999_v57  ;;  %v836_v19 = vld [vmem:[%s2434_s3 + $0x90] sm:$0xff]  ;;  %v837_v1 = vld [vmem:[%s2434_s3 + $0x98] sm:$0xff]  ;;  %v1375_v20 = vpack.c.bf16 %v819_v17, %v818_v0 }
 0x178   :  { %v463_v31 = vmax.f32 %v409_v26, 0.0  ;;  %v1377_v2 = vpack.c.bf16 %v837_v1, %v836_v19  ;;  %v820_v26 = vld [vmem:[%s2434_s3 + $0x10] sm:$0xff]  ;;  %v849_v17 = vld [vmem:[%s2434_s3 + $0xf8] sm:$0xff] }
 0x179   :  { %v414_v27 = vpop.f32.mrb[22].mxu0  ;;  %v1472_v28 = vpack.i.bf16 %v2051_v24, %v2049_v21  ;;  %v464_v25 = vmax.f32 %v411_v4, 0.0  ;;  %v821_v4 = vld [vmem:[%s2434_s3 + $0x18] sm:$0xff] }
 0x17a   :  { %v415_v29 = vadd.f32 %v414_v27, %v1997_v9  ;;  %v416_v18 = vpop.f32.mrb[23].mxu0  ;;  %v838_v27 = vld [vmem:[%s2434_s3 + $0xa0] sm:$0xff] }
 0x17b   :  { %v417_v30 = vadd.f32 %v416_v18, %v1999_v57  ;;  %1473 = vrot.lane.b32.xlu0 %v1472_v28, %s1645_s2  ;;  %v839_v28 = vld [vmem:[%s2434_s3 + $0xa8] sm:$0xff] }
 0x17c   :  { %v465_v33 = vmax.f32 %v415_v29, 0.0  ;;  %v1379_v29 = vpack.c.bf16 %v821_v4, %v820_v26  ;;  %v1381_v18 = vpack.c.bf16 %v839_v28, %v838_v27 }
 0x17d   :  { %v466_v34 = vmax.f32 %v417_v30, 0.0  ;;  %v420_v36 = vpop.f32.mrb[24].mxu0  ;;  %v822_v30 = vld [vmem:[%s2434_s3 + $0x20] sm:$0xff] }
 0x17e   :  { %v2060_v37 = vmax.f32 %v463_v31, %v465_v33  ;;  %v421_v38 = vadd.f32 %v420_v36, %v1997_v9  ;;  %v422_v40 = vpop.f32.mrb[25].mxu0  ;;  %v823_v31 = vld [vmem:[%s2434_s3 + $0x28] sm:$0xff]  ;;  %v840_v33 = vld [vmem:[%s2434_s3 + $0xb0] sm:$0xff] }
 0x17f   :  { %v2063_v39 = vmax.f32 %v464_v25, %v466_v34  ;;  %v423_v41 = vadd.f32 %v422_v40, %v1999_v57  ;;  %v841_v25 = vld [vmem:[%s2434_s3 + $0xb8] sm:$0xff]  ;;  %v1383_v34 = vpack.c.bf16 %v823_v31, %v822_v30 }
 0x180   :  { %v467_v44 = vmax.f32 %v421_v38, 0.0  ;;  %v1385_v36 = vpack.c.bf16 %v841_v25, %v840_v33  ;;  %v824_v38 = vld [vmem:[%s2434_s3 + $0x30] sm:$0xff]  ;;  %v825_v40 = vld [vmem:[%s2434_s3 + $0x38] sm:$0xff] }
 0x181   :  { %v426_v42 = vpop.f32.mrb[26].mxu0  ;;  %v1477_v43 = vpack.i.bf16 %v2063_v39, %v2060_v37  ;;  %v468_v50 = vmax.f32 %v423_v41, 0.0  ;;  %v1387_v41 = vpack.c.bf16 %v825_v40, %v824_v38 }
 0x182   :  { %v427_v45 = vadd.f32 %v426_v42, %v1997_v9  ;;  %v428_v46 = vpop.f32.mrb[27].mxu0  ;;  %v842_v42 = vld [vmem:[%s2434_s3 + $0xc0] sm:$0xff] }
 0x183   :  { %v429_v47 = vadd.f32 %v428_v46, %v1999_v57  ;;  %1478 = vrot.lane.b32.xlu1 %v1477_v43, %s1645_s2  ;;  %v843_v43 = vld [vmem:[%s2434_s3 + $0xc8] sm:$0xff] }
 0x184   :  { %v469_v48 = vmax.f32 %v427_v45, 0.0  ;;  %v826_v45 = vld [vmem:[%s2434_s3 + $0x40] sm:$0xff]  ;;  %v827_v46 = vld [vmem:[%s2434_s3 + $0x48] sm:$0xff] }
 0x185   :  { %v470_v52 = vmax.f32 %v429_v47, 0.0  ;;  %v432_v53 = vpop.f32.mrb[28].mxu0  ;;  %v1391_v47 = vpack.c.bf16 %v827_v46, %v826_v45 }
 0x186   :  { %v2071_v58 = vmax.f32 %v467_v44, %v469_v48  ;;  %v433_v59 = vadd.f32 %v432_v53, %v1997_v9  ;;  %v434_v54 = vpop.f32.mrb[29].mxu0  ;;  %v1389_v44 = vpack.c.bf16 %v843_v43, %v842_v42 }
 0x187   :  { %v2074_v60 = vmax.f32 %v468_v50, %v470_v52  ;;  %v435_v61 = vadd.f32 %v434_v54, %v1999_v57  ;;  %v844_v50 = vld [vmem:[%s2434_s3 + $0xd0] sm:$0xff]  ;;  %v845_v52 = vld [vmem:[%s2434_s3 + $0xd8] sm:$0xff] }
 0x188   :  { %v471_v63 = vmax.f32 %v433_v59, 0.0  ;;  %v1393_v53 = vpack.c.bf16 %v845_v52, %v844_v50  ;;  %v828_v59 = vld [vmem:[%s2434_s3 + $0x50] sm:$0xff]  ;;  %v829_v54 = vld [vmem:[%s2434_s3 + $0x58] sm:$0xff] }
 0x189   :  { %v438_v62 = vpop.f32.mrb[30].mxu0  ;;  %v1482_v55 = vpack.i.bf16 %v2074_v60, %v2071_v58  ;;  %v472_v11 = vmax.f32 %v435_v61, 0.0  ;;  %v1395_v61 = vpack.c.bf16 %v829_v54, %v828_v59 }
 0x18a   :  { %v439_v56 = vadd.f32 %v438_v62, %v1997_v9  ;;  %v440_v5 = vpop.f32.mrb[31].mxu0  ;;  %v834_v9 = vld [vmem:[%s2434_s3 + $0x80] sm:$0xff] }
 0x18b   :  { %v441_v7 = vadd.f32 %v440_v5, %v1999_v57  ;;  %1483 = vrot.lane.b32.xlu0 %v1482_v55, %s1645_s2  ;;  %v835_v57 = vld [vmem:[%s2434_s3 + $0x88] sm:$0xff] }
 0x18c   :  { %v473_v10 = vmax.f32 %v439_v56, 0.0  ;;  %v1373_v16 = vpack.c.bf16 %v835_v57, %v834_v9  ;;  %v847_v56 = vld [vmem:[%s2434_s3 + $0xe8] sm:$0xff] }
 0x18d   :  { %v474_v12 = vmax.f32 %v441_v7, 0.0 }
 0x18e   :  { %v2082_v13 = vmax.f32 %v471_v63, %v473_v10  ;;  %1374 = vmatprep.subr.bf16.mxu1 %v1373_v16  ;;  %v846_v63 = vld [vmem:[%s2434_s3 + $0xe0] sm:$0xff]  ;;  %v848_v16 = vld [vmem:[%s2434_s3 + $0xf0] sm:$0xff] }
 0x18f   :  { %v2084_v14 = vmax.f32 %v472_v11, %v474_v12  ;;  %1376 = vmatpush3.bf16.msra.mxu1 %v1375_v20  ;;  %v1397_v10 = vpack.c.bf16 %v847_v56, %v846_v63  ;;  %v830_v11 = vld [vmem:[%s2434_s3 + $0x60] sm:$0xff]  ;;  %v831_v12 = vld [vmem:[%s2434_s3 + $0x68] sm:$0xff]  ;;  %v1401_v20 = vpack.c.bf16 %v849_v17, %v848_v16 }
 0x190   :  { %1378 = vmatprep.subr.bf16.mxu1 %v1377_v2 }
 0x191   :  { %v1487_v15 = vpack.i.bf16 %v2084_v14, %v2082_v13 }
 0x193   :  { %1488 = vrot.lane.b32.xlu1 %v1487_v15, %s1645_s2  ;;  %1380 = vmatpush3.bf16.msra.mxu1 %v1379_v29  ;;  %v1399_v15 = vpack.c.bf16 %v831_v12, %v830_v11 }
 0x194   :  { %1382 = vmatprep.subr.bf16.mxu1 %v1381_v18 }
 0x197   :  { %1384 = vmatpush3.bf16.msra.mxu1 %v1383_v34 }
 0x198   :  { %1386 = vmatprep.subr.bf16.mxu1 %v1385_v36 }
 0x19b   :  { %1388 = vmatpush3.bf16.msra.mxu1 %v1387_v41 }
 0x19c   :  { %1390 = vmatprep.subr.bf16.mxu1 %v1389_v44 }
 0x19f   :  { %1392 = vmatpush3.bf16.msra.mxu1 %v1391_v47 }
 0x1a0   :  { %1394 = vmatprep.subr.bf16.mxu1 %v1393_v53 }
 0x1a3   :  { %1396 = vmatpush3.bf16.msra.mxu1 %v1395_v61 }
 0x1a4   :  { %1398 = vmatprep.subr.bf16.mxu1 %v1397_v10 }
 0x1a7   :  { %1400 = vmatpush3.bf16.msra.mxu1 %v1399_v15 }
 0x1a8   :  { %1402 = vmatprep.subr.bf16.mxu1 %v1401_v20 }
 0x1cd   :  { %v1454_v48 = vpop.permute.xlu0 %1453 }
 0x1ce   :  { %v1455_v62 = vunpack.i.l.bf16 %v1454_v48  ;;  %v1456_v9 = vunpack.i.h.bf16 %v1454_v48 }
 0x1d0   :  { %v2174_v57 = vmax.f32 %v2005_v22, %v1455_v62  ;;  %v832_v22 = vld [vmem:[%s2434_s3 + $0x70] sm:$0xff]  ;;  %v563_v2 = vmax.f32 %v2007_v23, %v1456_v9 }
 0x1d5   :  { %v1459_v55 = vpop.permute.xlu1 %1458 }
 0x1d6   :  { %v1461_v5 = vunpack.i.h.bf16 %v1459_v55  ;;  %v1460_v7 = vunpack.i.l.bf16 %v1459_v55 }
 0x1d8   :  { %v2177_v0 = vmax.f32 %v2016_v35, %v1460_v7  ;;  %v564_v19 = vmax.f32 %v2018_v32, %v1461_v5  ;;  %v833_v35 = vld [vmem:[%s2434_s3 + $0x78] sm:$0xff] }
 0x1d9   :  { %v1403_v32 = vpack.c.bf16 %v833_v35, %v832_v22 }
 0x1da   :  { %v1497_v1 = vpack.i.bf16 %v2177_v0, %v2174_v57  ;;  %v1507_v26 = vpack.i.bf16 %v564_v19, %v563_v2 }
 0x1db   :  { %1404 = vmatpush3.bf16.msra.mxu1 %v1403_v32 }
 0x1dc   :  { %1498 = vrot.lane.b32.xlu1 %v1497_v1, %s1646_s27  ;;  %1493 = vrot.lane.b32.xlu0 %v1497_v1, %s1645_s2 }
 0x1dd   :  { %v1464_v4 = vpop.permute.xlu0 %1463 }
 0x1de   :  { %v1465_v27 = vunpack.i.l.bf16 %v1464_v4  ;;  %v1466_v18 = vunpack.i.h.bf16 %v1464_v4 }
 0x1e0   :  { %1508 = vrot.lane.b32.xlu1 %v1507_v26, %s1647_s28  ;;  %1503 = vrot.lane.b32.xlu0 %v1497_v1, %s1648_s29  ;;  %v2202_v30 = vmax.f32 %v2027_v49, %v1465_v27  ;;  %v565_v34 = vmax.f32 %v2029_v51, %v1466_v18  ;;  %v851_v51 = vld [vmem:[%s2434_s3 + $0x108] sm:$0xff]  ;;  %v853_v18 = vld [vmem:[%s2434_s3 + $0x118] sm:$0xff] }
 0x1e4   :  { %1518 = vrot.lane.b32.xlu1 %v1507_v26, %s1649_s30  ;;  %1513 = vrot.lane.b32.xlu0 %v1507_v26, %s1650_s6 }
 0x1e5   :  { %v1469_v23 = vpop.permute.xlu1 %1468 }
 0x1e6   :  { %v1471_v28 = vunpack.i.h.bf16 %v1469_v23  ;;  %v1470_v29 = vunpack.i.l.bf16 %v1469_v23 }
 0x1e8   :  { %v2205_v31 = vmax.f32 %v2038_v6, %v1470_v29  ;;  %1523 = vrot.lane.b32.xlu0 %v1507_v26, %s1651_s7  ;;  %v566_v33 = vmax.f32 %v2040_v8, %v1471_v28  ;;  %v850_v8 = vld [vmem:[%s2434_s3 + $0x100] sm:$0xff]  ;;  %v852_v29 = vld [vmem:[%s2434_s3 + $0x110] sm:$0xff] }
 0x1e9   :  { %v2224_v40 = vpack.c.bf16 %v851_v51, %v850_v8 }
 0x1ea   :  { %v1527_v25 = vpack.i.bf16 %v2205_v31, %v2202_v30  ;;  %v1542_v36 = vpack.i.bf16 %v566_v33, %v565_v34 }
 0x1eb   :  { %1406 = vmatprep.subr.bf16.mxu1 %v2224_v40 }
 0x1ec   :  { %1528 = vrot.lane.b32.xlu1 %v1527_v25, %s1645_s2  ;;  %1533 = vrot.lane.b32.xlu0 %v1527_v25, %s1646_s27 }
 0x1ed   :  { %v1474_v49 = vpop.permute.xlu0 %1473 }
 0x1ee   :  { %v1475_v6 = vunpack.i.l.bf16 %v1474_v49  ;;  %v1476_v43 = vunpack.i.h.bf16 %v1474_v49 }
 0x1f0   :  { %1538 = vrot.lane.b32.xlu1 %v1527_v25, %s1648_s29  ;;  %1543 = vrot.lane.b32.xlu0 %v1542_v36, %s1647_s28  ;;  %v2228_v44 = vmax.f32 %v2049_v21, %v1475_v6  ;;  %v567_v48 = vmax.f32 %v2051_v24, %v1476_v43  ;;  %v1409_v6 = vpack.c.bf16 %v853_v18, %v852_v29  ;;  %v863_v29 = vld [vmem:[%s2434_s3 + $0x168] sm:$0xff] }
 0x1f4   :  { %1548 = vrot.lane.b32.xlu1 %v1542_v36, %s1650_s6  ;;  %1553 = vrot.lane.b32.xlu0 %v1542_v36, %s1649_s30 }
 0x1f5   :  { %v1479_v38 = vpop.permute.xlu1 %1478 }
 0x1f6   :  { %v1481_v41 = vunpack.i.h.bf16 %v1479_v38  ;;  %v1480_v42 = vunpack.i.l.bf16 %v1479_v38 }
 0x1f8   :  { %v2231_v45 = vmax.f32 %v2060_v37, %v1480_v42  ;;  %1558 = vrot.lane.b32.xlu1 %v1542_v36, %s1651_s7  ;;  %v568_v46 = vmax.f32 %v2063_v39, %v1481_v41  ;;  %v854_v41 = vld [vmem:[%s2434_s3 + $0x120] sm:$0xff]  ;;  %v855_v42 = vld [vmem:[%s2434_s3 + $0x128] sm:$0xff] }
 0x1fa   :  { %v1567_v47 = vpack.i.bf16 %v2231_v45, %v2228_v44  ;;  %v1577_v50 = vpack.i.bf16 %v568_v46, %v567_v48 }
 0x1fc   :  { %1568 = vrot.lane.b32.xlu1 %v1567_v47, %s1646_s27  ;;  %1563 = vrot.lane.b32.xlu0 %v1567_v47, %s1645_s2 }
 0x1fd   :  { %v1484_v52 = vpop.permute.xlu0 %1483 }
 0x1fe   :  { %v1486_v21 = vunpack.i.h.bf16 %v1484_v52  ;;  %v1485_v37 = vunpack.i.l.bf16 %v1484_v52  ;;  %v1413_v52 = vpack.c.bf16 %v855_v42, %v854_v41  ;;  %v865_v41 = vld [vmem:[%s2434_s3 + $0x178] sm:$0xff] }
 0x200   :  { %1578 = vrot.lane.b32.xlu1 %v1577_v50, %s1647_s28  ;;  %1573 = vrot.lane.b32.xlu0 %v1567_v47, %s1648_s29  ;;  %v569_v53 = vmax.f32 %v2074_v60, %v1486_v21  ;;  %v2246_v59 = vmax.f32 %v2071_v58, %v1485_v37 }
 0x204   :  { %1588 = vrot.lane.b32.xlu1 %v1577_v50, %s1649_s30  ;;  %1583 = vrot.lane.b32.xlu0 %v1577_v50, %s1650_s6 }
 0x205   :  { %v1489_v39 = vpop.permute.xlu1 %1488 }
 0x206   :  { %v1490_v24 = vunpack.i.l.bf16 %v1489_v39  ;;  %v1491_v61 = vunpack.i.h.bf16 %v1489_v39 }
 0x208   :  { %v2249_v54 = vmax.f32 %v2082_v13, %v1490_v24  ;;  %695 = vrot.lane.b32.xlu1 %v569_v53, %s1650_s6  ;;  %1593 = vrot.lane.b32.xlu0 %v1577_v50, %s1651_s7  ;;  %v570_v60 = vmax.f32 %v2084_v14, %v1491_v61  ;;  %v857_v24 = vld [vmem:[%s2434_s3 + $0x138] sm:$0xff] }
 0x20a   :  { %v1597_v62 = vpack.i.bf16 %v2249_v54, %v2246_v59  ;;  %v1612_v58 = vpack.i.bf16 %v570_v60, %v569_v53 }
 0x20c   :  { %1598 = vrot.lane.b32.xlu1 %v1597_v62, %s1645_s2  ;;  %719 = vrot.lane.b32.xlu0 %v569_v53, %s1649_s30 }
 0x210   :  { %1608 = vrot.lane.b32.xlu1 %v1597_v62, %s1648_s29  ;;  %1603 = vrot.lane.b32.xlu0 %v1597_v62, %s1646_s27 }
 0x214   :  { %743 = vrot.lane.b32.xlu1 %v569_v53, %s1651_s7  ;;  %1613 = vrot.lane.b32.xlu0 %v1612_v58, %s1647_s28  ;;  %v856_v53 = vld [vmem:[%s2434_s3 + $0x130] sm:$0xff] }
 0x218   :  { %721 = vrot.lane.b32.xlu1 %v570_v60, %s1649_s30  ;;  %697 = vrot.lane.b32.xlu0 %v570_v60, %s1650_s6 }
 0x21c   :  { %745 = vrot.lane.b32.xlu0 %v570_v60, %s1651_s7 }
 0x24e   :  { %v1499_v13 = vpop.permute.xlu1 %1498  ;;  %v1494_v55 = vpop.permute.xlu0 %1493 }
 0x24f   :  { %v1496_v63 = vunpack.i.h.bf16 %v1494_v55  ;;  %v1495_v14 = vunpack.i.l.bf16 %v1494_v55  ;;  %v1500_v56 = vunpack.i.l.bf16 %v1499_v13  ;;  %v1501_v7 = vunpack.i.h.bf16 %v1499_v13 }
 0x250   :  { %v1417_v13 = vpack.c.bf16 %v857_v24, %v856_v53 }
 0x251   :  { %v756_v5 = vsel %vm755_vm6, %v2174_v57, %v1495_v14  ;;  %v757_v12 = vsel %vm755_vm6, %v2177_v0, %v1496_v63 }
 0x252   :  { %v1509_v10 = vpop.permute.xlu1 %1508  ;;  %v1504_v11 = vpop.permute.xlu0 %1503  ;;  %v765_v17 = vsel %vm764_vm7, %v756_v5, %v1500_v56  ;;  %v766_v22 = vsel %vm764_vm7, %v757_v12, %v1501_v7  ;;  %v859_v5 = vld [vmem:[%s2434_s3 + $0x148] sm:$0xff] }
 0x253   :  { %v1506_v15 = vunpack.i.h.bf16 %v1504_v11  ;;  %v1505_v9 = vunpack.i.l.bf16 %v1504_v11  ;;  %v1510_v16 = vunpack.i.l.bf16 %v1509_v10  ;;  %v1511_v1 = vunpack.i.h.bf16 %v1509_v10 }
 0x255   :  { %v774_v19 = vsel %vm773_vm8, %v765_v17, %v1505_v9  ;;  %v775_v20 = vsel %vm773_vm8, %v766_v22, %v1506_v15  ;;  %v860_v22 = vld [vmem:[%s2434_s3 + $0x150] sm:$0xff] }
 0x256   :  { %v1519_v57 = vpop.permute.xlu1 %1518  ;;  %v1514_v35 = vpop.permute.xlu0 %1513  ;;  %v783_v0 = vsel %vm782_vm9, %v774_v19, %v1510_v16  ;;  %v784_v28 = vsel %vm782_vm9, %v775_v20, %v1511_v1 }
 0x257   :  { %v1516_v2 = vunpack.i.h.bf16 %v1514_v35  ;;  %v1515_v32 = vunpack.i.l.bf16 %v1514_v35  ;;  %v1520_v26 = vunpack.i.l.bf16 %v1519_v57  ;;  %v1521_v27 = vunpack.i.h.bf16 %v1519_v57  ;;  %v861_v57 = vld [vmem:[%s2434_s3 + $0x158] sm:$0xff] }
 0x259   :  { %v792_v4 = vsel %vm791_vm10, %v783_v0, %v1515_v32  ;;  %v793_v34 = vsel %vm791_vm10, %v784_v28, %v1516_v2  ;;  %v1425_v0 = vpack.c.bf16 %v861_v57, %v860_v22  ;;  %v862_v28 = vld [vmem:[%s2434_s3 + $0x160] sm:$0xff] }
 0x25a   :  { %v1524_v23 = vpop.permute.xlu0 %1523  ;;  %v801_v36 = vsel %vm800_vm11, %v792_v4, %v1520_v26  ;;  %v802_v38 = vsel %vm800_vm11, %v793_v34, %v1521_v27 }
 0x25b   :  { %v1526_v33 = vunpack.i.h.bf16 %v1524_v23  ;;  %v1525_v25 = vunpack.i.l.bf16 %v1524_v23 }
 0x25d   :  { %v810_v49 = vsel %vm809_vm12, %v801_v36, %v1525_v25  ;;  %v2294_v47 = vsel %vm809_vm12, %v802_v38, %v1526_v33  ;;  %v864_v38 = vld [vmem:[%s2434_s3 + $0x170] sm:$0xff] }
 0x25e   :  { %v1529_v8 = vpop.permute.xlu1 %1528  ;;  %v1534_v51 = vpop.permute.xlu0 %1533  ;;  %937 = vmatprep.mubr.f32.mxu1 %v810_v49 }
 0x25f   :  { %v1531_v43 = vunpack.i.h.bf16 %v1529_v8  ;;  %v1530_v46 = vunpack.i.l.bf16 %v1529_v8  ;;  %938 = vmatmul.mubr.f32.vlgmr.msra.gmra.mrb[0].mxu1 %v1642_v3  ;;  %v1535_v48 = vunpack.i.l.bf16 %v1534_v51  ;;  %v1536_v21 = vunpack.i.h.bf16 %v1534_v51 }
 0x260   :  { %942 = vmatprep.mubr.f32.mxu1 %v2294_v47  ;;  %1408 = vmatpush3.bf16.msra.mxu1 %v2224_v40 }
 0x261   :  { %v758_v50 = vsel %vm755_vm6, %v2202_v30, %v1530_v46  ;;  %1410 = vmatprep.subr.bf16.mxu1 %v1409_v6  ;;  %v759_v61 = vsel %vm755_vm6, %v2205_v31, %v1531_v43  ;;  %v858_v31 = vld [vmem:[%s2434_s3 + $0x140] sm:$0xff] }
 0x262   :  { %v1539_v37 = vpop.permute.xlu1 %1538  ;;  %v1544_v39 = vpop.permute.xlu0 %1543  ;;  %v767_v30 = vsel %vm764_vm7, %v758_v50, %v1535_v48  ;;  %v768_v55 = vsel %vm764_vm7, %v759_v61, %v1536_v21  ;;  %v1421_v16 = vpack.c.bf16 %v859_v5, %v858_v31 }
 0x263   :  { %v1541_v40 = vunpack.i.h.bf16 %v1539_v37  ;;  %v1540_v62 = vunpack.i.l.bf16 %v1539_v37  ;;  %943 = vmatmul.mubr.f32.gmra.mrb[2].mxu1 %v810_v49  ;;  %v1545_v60 = vunpack.i.l.bf16 %v1544_v39  ;;  %v1546_v63 = vunpack.i.h.bf16 %v1544_v39 }
 0x264   :  { %1412 = vmatpush3.bf16.msra.mxu1 %v1409_v6  ;;  %v1429_v49 = vpack.c.bf16 %v863_v29, %v862_v28 }
 0x265   :  { %v776_v58 = vsel %vm773_vm8, %v767_v30, %v1540_v62  ;;  %1414 = vmatprep.subr.bf16.mxu1 %v1413_v52  ;;  %v777_v7 = vsel %vm773_vm8, %v768_v55, %v1541_v40 }
 0x266   :  { %v1549_v14 = vpop.permute.xlu1 %1548  ;;  %v1554_v56 = vpop.permute.xlu0 %1553  ;;  %v785_v12 = vsel %vm782_vm9, %v776_v58, %v1545_v60  ;;  %v786_v17 = vsel %vm782_vm9, %v777_v7, %v1546_v63 }
 0x267   :  { %v1551_v10 = vunpack.i.h.bf16 %v1549_v14  ;;  %v1550_v11 = vunpack.i.l.bf16 %v1549_v14  ;;  %v1555_v15 = vunpack.i.l.bf16 %v1554_v56  ;;  %v1556_v19 = vunpack.i.h.bf16 %v1554_v56 }
 0x268   :  { %1416 = vmatpush3.bf16.msra.mxu1 %v1413_v52  ;;  %v1433_v52 = vpack.c.bf16 %v865_v41, %v864_v38 }
 0x269   :  { %v794_v9 = vsel %vm791_vm10, %v785_v12, %v1550_v11  ;;  %1418 = vmatprep.subr.bf16.mxu1 %v1417_v13  ;;  %v795_v2 = vsel %vm791_vm10, %v786_v17, %v1551_v10 }
 0x26a   :  { %v1559_v1 = vpop.permute.xlu1 %1558  ;;  %v803_v32 = vsel %vm800_vm11, %v794_v9, %v1555_v15  ;;  %v804_v23 = vsel %vm800_vm11, %v795_v2, %v1556_v19 }
 0x26b   :  { %v1561_v35 = vunpack.i.h.bf16 %v1559_v1  ;;  %v1560_v20 = vunpack.i.l.bf16 %v1559_v1 }
 0x26c   :  { %1420 = vmatpush3.bf16.msra.mxu1 %v1417_v13 }
 0x26d   :  { %v2330_v26 = vsel %vm809_vm12, %v803_v32, %v1560_v20  ;;  %1422 = vmatprep.subr.bf16.mxu1 %v1421_v16  ;;  %v2342_v25 = vsel %vm809_vm12, %v804_v23, %v1561_v35 }
 0x26e   :  { %v1569_v4 = vpop.permute.xlu1 %1568  ;;  %v1564_v27 = vpop.permute.xlu0 %1563  ;;  %947 = vmatprep.mubr.f32.mxu1 %v2330_v26 }
 0x26f   :  { %v1566_v18 = vunpack.i.h.bf16 %v1564_v27  ;;  %v1565_v33 = vunpack.i.l.bf16 %v1564_v27  ;;  %948 = vmatmul.mubr.f32.gmra.mrb[4].mxu1 %v2294_v47  ;;  %v1570_v34 = vunpack.i.l.bf16 %v1569_v4  ;;  %v1571_v6 = vunpack.i.h.bf16 %v1569_v4 }
 0x270   :  { %952 = vmatprep.mubr.f32.mxu1 %v2342_v25  ;;  %1424 = vmatpush3.bf16.msra.mxu1 %v1421_v16 }
 0x271   :  { %v760_v36 = vsel %vm755_vm6, %v2228_v44, %v1565_v33  ;;  %1426 = vmatprep.subr.bf16.mxu1 %v1425_v0  ;;  %v761_v42 = vsel %vm755_vm6, %v2231_v45, %v1566_v18 }
 0x272   :  { %v1579_v8 = vpop.permute.xlu1 %1578  ;;  %v1574_v51 = vpop.permute.xlu0 %1573  ;;  %v769_v48 = vsel %vm764_vm7, %v760_v36, %v1570_v34  ;;  %v770_v37 = vsel %vm764_vm7, %v761_v42, %v1571_v6 }
 0x273   :  { %v1576_v43 = vunpack.i.h.bf16 %v1574_v51  ;;  %v1575_v46 = vunpack.i.l.bf16 %v1574_v51  ;;  %953 = vmatmul.mubr.f32.gmra.mrb[6].mxu1 %v2330_v26  ;;  %v1580_v44 = vunpack.i.l.bf16 %v1579_v8  ;;  %v1581_v21 = vunpack.i.h.bf16 %v1579_v8 }
 0x274   :  { %1428 = vmatpush3.bf16.msra.mxu1 %v1425_v0 }
 0x275   :  { %v778_v50 = vsel %vm773_vm8, %v769_v48, %v1575_v46  ;;  %1430 = vmatprep.subr.bf16.mxu1 %v1429_v49  ;;  %v779_v24 = vsel %vm773_vm8, %v770_v37, %v1576_v43 }
 0x276   :  { %v1589_v39 = vpop.permute.xlu1 %1588  ;;  %v1584_v53 = vpop.permute.xlu0 %1583  ;;  %v787_v62 = vsel %vm782_vm9, %v778_v50, %v1580_v44  ;;  %v788_v55 = vsel %vm782_vm9, %v779_v24, %v1581_v21 }
 0x277   :  { %v1586_v45 = vunpack.i.h.bf16 %v1584_v53  ;;  %v1585_v61 = vunpack.i.l.bf16 %v1584_v53  ;;  %v1590_v40 = vunpack.i.l.bf16 %v1589_v39  ;;  %v1591_v60 = vunpack.i.h.bf16 %v1589_v39 }
 0x278   :  { %1432 = vmatpush3.bf16.msra.mxu1 %v1429_v49 }
 0x279   :  { %v796_v30 = vsel %vm791_vm10, %v787_v62, %v1585_v61  ;;  %1434 = vmatprep.subr.bf16.mxu1 %v1433_v52  ;;  %v797_v56 = vsel %vm791_vm10, %v788_v55, %v1586_v45 }
 0x27a   :  { %v696_v58 = vpop.permute.xlu1 %695  ;;  %v1594_v13 = vpop.permute.xlu0 %1593  ;;  %v805_v31 = vsel %vm800_vm11, %v796_v30, %v1590_v40  ;;  %v806_v11 = vsel %vm800_vm11, %v797_v56, %v1591_v60  ;;  %v1218_v60 = vld [vmem:[%s2435_s4] ss:$0 sm:$0xff]  ;;  %s1652_s4 = smov 124  }
 0x27b   :  { %v1596_v63 = vunpack.i.h.bf16 %v1594_v13  ;;  %v1595_v14 = vunpack.i.l.bf16 %v1594_v13 }
 0x27c   :  { %1436 = vmatpush3.bf16.msra.mxu1 %v1433_v52 }
 0x27d   :  { %v814_v5 = vsel %vm809_vm12, %v805_v31, %v1595_v14  ;;  %v815_v12 = vsel %vm809_vm12, %v806_v11, %v1596_v63 }
 0x27e   :  { %v1599_v7 = vpop.permute.xlu1 %1598  ;;  %v720_v10 = vpop.permute.xlu0 %719  ;;  %957 = vmatprep.mubr.f32.mxu1 %v814_v5 }
 0x27f   :  { %958 = vmatmul.mubr.f32.gmra.mrb[8].mxu1 %v2342_v25  ;;  %v1601_v15 = vunpack.i.h.bf16 %v1599_v7  ;;  %v1600_v9 = vunpack.i.l.bf16 %v1599_v7 }
 0x280   :  { %962 = vmatprep.mubr.f32.mxu1 %v815_v12 }
 0x281   :  { %v763_v22 = vsel %vm755_vm6, %v2249_v54, %v1601_v15  ;;  %v762_v57 = vsel %vm755_vm6, %v2246_v59, %v1600_v9 }
 0x282   :  { %v1609_v16 = vpop.permute.xlu1 %1608  ;;  %v1604_v17 = vpop.permute.xlu0 %1603 }
 0x283   :  { %v1606_v19 = vunpack.i.h.bf16 %v1604_v17  ;;  %v1605_v1 = vunpack.i.l.bf16 %v1604_v17  ;;  %963 = vmatmul.mubr.f32.gmra.mrb[10].mxu1 %v814_v5  ;;  %v1611_v35 = vunpack.i.h.bf16 %v1609_v16  ;;  %v1610_v20 = vunpack.i.l.bf16 %v1609_v16 }
 0x285   :  { %v772_v2 = vsel %vm764_vm7, %v763_v22, %v1606_v19  ;;  %v771_v32 = vsel %vm764_vm7, %v762_v57, %v1605_v1 }
 0x286   :  { %v744_v0 = vpop.permute.xlu1 %743  ;;  %v1614_v4 = vpop.permute.xlu0 %1613  ;;  %v780_v28 = vsel %vm773_vm8, %v771_v32, %v1610_v20  ;;  %v781_v29 = vsel %vm773_vm8, %v772_v2, %v1611_v35 }
 0x287   :  { %v1616_v27 = vunpack.i.h.bf16 %v1614_v4  ;;  %v1615_v23 = vunpack.i.l.bf16 %v1614_v4 }
 0x289   :  { %v789_v18 = vsel %vm782_vm9, %v780_v28, %v1615_v23  ;;  %v790_v54 = vsel %vm782_vm9, %v781_v29, %v1616_v27 }
 0x28a   :  { %v698_v33 = vpop.permute.xlu0 %697  ;;  %v798_v59 = vsel %vm791_vm10, %v789_v18, %v696_v58  ;;  %v722_v34 = vpop.permute.xlu1 %721 }
 0x28b   :  { %v799_v36 = vsel %vm791_vm10, %v790_v54, %v698_v33  ;;  %v807_v49 = vsel %vm800_vm11, %v798_v59, %v720_v10 }
 0x28c   :  { %v816_v6 = vsel %vm809_vm12, %v807_v49, %v744_v0  ;;  %v808_v51 = vsel %vm800_vm11, %v799_v36, %v722_v34 }
 0x28d   :  { %967 = vmatprep.mubr.f32.mxu1 %v816_v6 }
 0x28e   :  { %v746_v8 = vpop.permute.xlu0 %745  ;;  %968 = vmatmul.mubr.f32.gmra.mrb[12].mxu1 %v815_v12 }
 0x28f   :  { %v817_v38 = vsel %vm809_vm12, %v808_v51, %v746_v8 }
 0x290   :  { %972 = vmatprep.mubr.f32.mxu1 %v817_v38 }
 0x292   :  { %973 = vmatmul.mubr.f32.gmra.mrb[14].mxu1 %v816_v6 }
 0x293   :  { %1331 = vmatprep.mubr.f32.mxu1 %v2294_v47 }
 0x296   :  { %1332 = vmatmul.mubr.f32.vlgmr.msra.gmra.mrb[16].mxu1 %v2330_v26 }
 0x297   :  { %1334 = vmatprep.mubr.f32.mxu1 %v2342_v25 }
 0x29a   :  { %1335 = vmatmul.mubr.f32.gmra.mrb[18].mxu1 %v814_v5 }
 0x29b   :  { %1337 = vmatprep.mubr.f32.mxu1 %v815_v12 }
 0x29e   :  { %1338 = vmatmul.mubr.f32.gmra.mrb[20].mxu1 %v816_v6 }
 0x29f   :  { %1340 = vmatprep.mubr.f32.mxu1 %v817_v38 }
 0x2a2   :  { %1341 = vmatmul.mubr.f32.gmra.mrb[22].mxu1 %v1642_v3 }
 0x332   :  { %v1251_v41 = vpop.f32.mrb[0].mxu1 }
 0x333   :  { %v1252_v42 = vpop.f32.mrb[1].mxu1 }
 0x334   :  { %v1253_v43 = vadd.f32 %v1252_v42, %v1251_v41 }
 0x336   :  { %v1254_v46 = vpop.f32.mrb[2].mxu1  ;;  %v940_v14 = vadd.f32 %v1253_v43, %v1218_v60 }
 0x337   :  { %v1255_v44 = vpop.f32.mrb[3].mxu1 }
 0x338   :  { %v1256_v48 = vadd.f32 %v1255_v44, %v1254_v46 }
 0x33a   :  { %v945_v55 = vadd.f32 %v1256_v48, %v1218_v60 }
 0x342   :  { %v1257_v50 = vpop.f32.mrb[4].mxu1 }
 0x343   :  { %v1258_v52 = vpop.f32.mrb[5].mxu1 }
 0x344   :  { %v1259_v21 = vadd.f32 %v1258_v52, %v1257_v50 }
 0x346   :  { %v1260_v47 = vpop.f32.mrb[6].mxu1  ;;  %v950_v15 = vadd.f32 %v1259_v21, %v1218_v60 }
 0x347   :  { %v1261_v37 = vpop.f32.mrb[7].mxu1 }
 0x348   :  { %v1262_v26 = vadd.f32 %v1261_v37, %v1260_v47 }
 0x34a   :  { %v955_v10 = vadd.f32 %v1262_v26, %v1218_v60 }
 0x352   :  { %v1263_v39 = vpop.f32.mrb[8].mxu1 }
 0x353   :  { %v1264_v25 = vpop.f32.mrb[9].mxu1 }
 0x354   :  { %v1265_v53 = vadd.f32 %v1264_v25, %v1263_v39 }
 0x356   :  { %v1266_v24 = vpop.f32.mrb[10].mxu1  ;;  %v960_v20 = vadd.f32 %v1265_v53, %v1218_v60 }
 0x357   :  { %v1267_v45 = vpop.f32.mrb[11].mxu1 }
 0x358   :  { %v1268_v61 = vadd.f32 %v1267_v45, %v1266_v24 }
 0x35a   :  { %v965_v22 = vadd.f32 %v1268_v61, %v1218_v60 }
 0x361   :  { %v1269_v40 = vpop.f32.mrb[12].mxu1 }
 0x362   :  { %v1270_v3 = vpop.f32.mrb[13].mxu1 }
 0x363   :  { %v1271_v62 = vadd.f32 %v1270_v3, %v1269_v40 }
 0x365   :  { %v1272_v30 = vpop.f32.mrb[14].mxu1  ;;  %v970_v18 = vadd.f32 %v1271_v62, %v1218_v60 }
 0x366   :  { %v1273_v58 = vpop.f32.mrb[15].mxu1 }
 0x367   :  { %v1274_v13 = vadd.f32 %v1273_v58, %v1272_v30 }
 0x369   :  { %v1333_v63 = vpop.f32.mrb[16].mxu1  ;;  %v975_v23 = vadd.f32 %v1274_v13, %v1218_v60 }
 0x36a   :  { %v1050_v56 = vadd.f32 %v1333_v63, %v945_v55  ;;  %v1044_v31 = vpop.f32.mrb[17].mxu1 }
 0x36b   :  { %v1045_v5 = vadd.f32 %v1044_v31, %v940_v14 }
 0x36c   :  { %v1084_v7 = vmax.f32 %v1050_v56, 0.0 }
 0x36d   :  { %v1083_v11 = vmax.f32 %v1045_v5, 0.0  ;;  %v1336_v12 = vpop.f32.mrb[18].mxu1 }
 0x36e   :  { %v1060_v9 = vadd.f32 %v1336_v12, %v955_v10  ;;  %v1054_v16 = vpop.f32.mrb[19].mxu1 }
 0x36f   :  { %v1091_v17 = vmax.f32 %v1083_v11, %v1084_v7  ;;  %v1055_v19 = vadd.f32 %v1054_v16, %v950_v15 }
 0x370   :  { %v1086_v1 = vmax.f32 %v1060_v9, 0.0 }
 0x371   :  { %v1085_v57 = vmax.f32 %v1055_v19, 0.0  ;;  %v1339_v35 = vpop.f32.mrb[20].mxu1 }
 0x372   :  { %v1070_v2 = vadd.f32 %v1339_v35, %v965_v22  ;;  %v1064_v32 = vpop.f32.mrb[21].mxu1 }
 0x373   :  { %v1092_v0 = vmax.f32 %v1085_v57, %v1086_v1  ;;  %v1065_v4 = vadd.f32 %v1064_v32, %v960_v20 }
 0x374   :  { %v1088_v27 = vmax.f32 %v1070_v2, 0.0 }
 0x375   :  { %v1087_v28 = vmax.f32 %v1065_v4, 0.0  ;;  %v1342_v29 = vpop.f32.mrb[22].mxu1  ;;  %1101 = vrot.lane.b32.xlu1 %v1092_v0, %s1652_s4 }
 0x376   :  { %v1080_v54 = vadd.f32 %v1342_v29, %v975_v23  ;;  %v1074_v33 = vpop.f32.mrb[23].mxu1 }
 0x377   :  { %v1093_v59 = vmax.f32 %v1087_v28, %v1088_v27  ;;  %v1075_v34 = vadd.f32 %v1074_v33, %v970_v18 }
 0x378   :  { %v1090_v36 = vmax.f32 %v1080_v54, 0.0 }
 0x379   :  { %v1089_v49 = vmax.f32 %v1075_v34, 0.0  ;;  %1103 = vrot.lane.b32.xlu0 %v1093_v59, %s1652_s4 }
 0x37b   :  { %v1094_v6 = vmax.f32 %v1089_v49, %v1090_v36 }
 0x37d   :  { %1105 = vrot.lane.b32.xlu1 %v1094_v6, %s1652_s4  ;;  %1099 = vrot.lane.b32.xlu0 %v1091_v17, %s1652_s4 }
 0x3e7   :  { %v1102_v8 = vpop.permute.xlu1 %1101 }
 0x3e8   :  { %v1112_v51 = vmax.f32 %v1092_v0, %v1102_v8 }
 0x3ea   :  { %1121 = vrot.lane.b32.xlu1 %v1112_v51, %s1652_s4  ;;  %1145 = vrot.lane.b32.xlu0 %v1112_v51, %s1653_s15 }
 0x3eb   :  { %v1104_v38 = vpop.permute.xlu0 %1103 }
 0x3ec   :  { %v1113_v41 = vmax.f32 %v1093_v59, %v1104_v38 }
 0x3ee   :  { %1133 = vrot.lane.b32.xlu1 %v1112_v51, %s1654_s16  ;;  %1123 = vrot.lane.b32.xlu0 %v1113_v41, %s1652_s4 }
 0x3ef   :  { %v1106_v42 = vpop.permute.xlu1 %1105  ;;  %v1100_v46 = vpop.permute.xlu0 %1099 }
 0x3f0   :  { %v1114_v43 = vmax.f32 %v1094_v6, %v1106_v42  ;;  %v1111_v44 = vmax.f32 %v1091_v17, %v1100_v46 }
 0x3f2   :  { %1135 = vrot.lane.b32.xlu1 %v1113_v41, %s1654_s16  ;;  %1125 = vrot.lane.b32.xlu0 %v1114_v43, %s1652_s4 }
 0x3f6   :  { %1137 = vrot.lane.b32.xlu1 %v1114_v43, %s1654_s16  ;;  %1147 = vrot.lane.b32.xlu0 %v1113_v41, %s1653_s15 }
 0x3fa   :  { %1149 = vrot.lane.b32.xlu1 %v1114_v43, %s1653_s15  ;;  %1119 = vrot.lane.b32.xlu0 %v1111_v44, %s1652_s4 }
 0x3fe   :  { %1131 = vrot.lane.b32.xlu1 %v1111_v44, %s1654_s16  ;;  %1143 = vrot.lane.b32.xlu0 %v1111_v44, %s1653_s15 }
 0x45c   :  { %v1122_v48 = vpop.permute.xlu1 %1121  ;;  %v1146_v50 = vpop.permute.xlu0 %1145 }
 0x45d   :  { %v1157_v52 = vsel %vm1155_vm13, %v1112_v51, %v1122_v48 }
 0x460   :  { %v1134_v21 = vpop.permute.xlu1 %1133  ;;  %v1124_v47 = vpop.permute.xlu0 %1123 }
 0x461   :  { %v1162_v37 = vsel %vm1160_vm14, %v1157_v52, %v1134_v21  ;;  %v1158_v53 = vsel %vm1155_vm13, %v1113_v41, %v1124_v47 }
 0x462   :  { %v1167_v26 = vsel %vm1165_vm15, %v1162_v37, %v1146_v50 }
 0x463   :  { %1171 = vrot.lane.b32.xlu1 %v1167_v26, %s1651_s7 }
 0x464   :  { %v1136_v39 = vpop.permute.xlu1 %1135  ;;  %v1126_v25 = vpop.permute.xlu0 %1125 }
 0x465   :  { %v1163_v24 = vsel %vm1160_vm14, %v1158_v53, %v1136_v39  ;;  %v1159_v3 = vsel %vm1155_vm13, %v1114_v43, %v1126_v25 }
 0x468   :  { %v1138_v45 = vpop.permute.xlu1 %1137  ;;  %v1148_v61 = vpop.permute.xlu0 %1147 }
 0x469   :  { %v1168_v40 = vsel %vm1165_vm15, %v1163_v24, %v1148_v61  ;;  %v1164_v62 = vsel %vm1160_vm14, %v1159_v3, %v1138_v45 }
 0x46a   :  { %1175 = vrot.lane.b32.xlu0 %v1168_v40, %s1649_s30  ;;  %s1655_s30 = smov [#allocation2]  }
 0x46b   :  { %s1192_s7 = sshll.u32 %s1655_s30, 4  ;;  %s1193_s7 = int_to_ptr.vmem [resolvable:$true] %s1192_s7 }
 0x46c   :  { %v1150_v30 = vpop.permute.xlu1 %1149  ;;  %v1120_v60 = vpop.permute.xlu0 %1119  ;;  %p1622_p1 = scmp.lt.s32.totalorder %s1193_s7, %s1193_s7 }
 0x46d   :  { %v1169_v58 = vsel %vm1165_vm15, %v1164_v62, %v1150_v30  ;;  %v1156_v13 = vsel %vm1155_vm13, %v1111_v44, %v1120_v60 }
 0x46e   :  { %1179 = vrot.lane.b32.xlu1 %v1169_v58, %s1650_s6  ;;  %s1617_s6 = scalar_lea.vmem %s1193_s7, 128 }
 0x46f   :  { %p1618_p0 = scmp.ne.s32.totalorder %s1193_s7, %s1617_s6  ;;  %p1623_p2 = scmp.lt.s32.totalorder %s1617_s6, %s1617_s6 }
 0x470   :  { %v1132_v55 = vpop.permute.xlu1 %1131  ;;  %v1144_v63 = vpop.permute.xlu0 %1143 }
 0x471   :  { %v1161_v14 = vsel %vm1160_vm14, %v1156_v13, %v1132_v55  ;;  %p1624_p3 = por %p1623_p2, %p1622_p1 }
 0x472   :  { %v1166_v56 = vsel %vm1165_vm15, %v1161_v14, %v1144_v63 }
 0x473   :  { %p1625_p4 = pnand %p1624_p3, %p1618_p0 }
 0x4d5   :  { %v1172_v31 = vpop.permute.xlu1 %1171 }
 0x4d6   :  { %v1182_v7 = vsel %vm755_vm6, %v1166_v56, %v1172_v31 }
 0x4dc   :  { %v1176_v5 = vpop.permute.xlu0 %1175 }
 0x4dd   :  { %v1183_v10 = vsel %vm764_vm7, %v1182_v7, %v1176_v5 }
 0x4e0   :  { %v1180_v11 = vpop.permute.xlu1 %1179 }
 0x4e1   :  { %v1184_v12 = vsel %vm773_vm8, %v1183_v10, %v1180_v11 }
 0x4e2   :  { %1185 = vst.msk [vmem:[#allocation2] sm:$0xff] %vm782_vm9, %v1184_v12 }
 0x4e3   :  { %1628 = shalt.err (!%p1625_p4)
}
 0x4e4   :  { %s1629_s25 = scalar_lea.hbm %s2436_s5, 128 }
 0x4e5   :  { %p1630_p5 = scmp.ne.s32.totalorder %s2436_s5, %s1629_s25  ;;  %p1633_p6 = scmp.lt.u32.totalorder %s1629_s25, %s2436_s5 }
 0x4e7   :  { %p1635_p7 = pnand %p1633_p6, %p1630_p5 }
 0x4e9   :  { %1638 = shalt.err (!%p1635_p7)
}
 0x4ea   :  { %1195 = dma.vmem_to_hbm [thread:$0]  %s1193_s7, 128, %s2436_s5, [#allocation3]  }
 0x4eb   :  { %1639 = dma.done.wait [#allocation3], 128  }
 0x4ec   :  { %1640 = vsyncadd [#allocation3], 4294967168 }
 0x4ed   :  { %1199 = vsyncpa [#allocation3], 1 }

</bundles_post_ra>
